<compile_context>
chip_gen: v6e
topology: v6e:2x2x1
jax: 0.10.0
libtpu: 0.0.40
codegen_flags: <defaults>
</compile_context>

<pallas_src>
import jax
import jax.numpy as jnp
import numpy as np
from jax.experimental import pallas as pl
from jax.experimental.pallas import tpu as pltpu


def spellcheck_kernel(idx_ref, t1_ref, b1_ref, w2_ref, b2_ref, wf_ref, bf_ref,
                      out_ref):
    tb, L = idx_ref.shape          # sequences per grid step, sequence length
    M = tb * L                     # packed rows
    char_v = t1_ref.shape[1]
    c2 = w2_ref.shape[2]

    # ---- One-hot over the char vocab (exact 0/1 in bf16), lane-dense, built
    # from the compact (TB, L) int32 block and collapsed to (M, char_v).
    idx = idx_ref[...]
    lane = jax.lax.broadcasted_iota(jnp.int32, (tb, L, char_v), 2)
    one_hot = (lane == idx[:, :, None]).astype(jnp.bfloat16).reshape(M, char_v)

    # ---- Boundary keep-masks from an in-kernel iota (no pos input needed);
    # they zero the conv taps at sequence edges AND any cross-sequence wrap.
    pos = jax.lax.broadcasted_iota(jnp.int32, (tb, L, 1), 1).reshape(M, 1)
    keep_prev = (pos != 0).astype(jnp.float32)        # no x[t-1] at t == 0
    keep_next = (pos != L - 1).astype(jnp.float32)    # no x[t+1] at t == L-1

    def conv3_relu(h_bf16, w_ref, b_ref):
        # Conv1d(k=3, pad=1) as three accumulating per-tap matmuls; the tap
        # shifts are XLU sublane rotations (pltpu.roll) + keep-masks, instead
        # of materializing an (M, 3*Cin) im2col slab.
        y_prev = jnp.dot(h_bf16, w_ref[0], preferred_element_type=jnp.float32)
        y_cur = jnp.dot(h_bf16, w_ref[1], preferred_element_type=jnp.float32)
        y_next = jnp.dot(h_bf16, w_ref[2], preferred_element_type=jnp.float32)
        y = y_cur
        y = y + keep_prev * pltpu.roll(y_prev, 1, 0)       # out[t] += y_prev[t-1]
        y = y + keep_next * pltpu.roll(y_next, M - 1, 0)   # out[t] += y_next[t+1]
        return jnp.maximum(y + b_ref[...], 0.0)            # bias + ReLU in f32

    # conv1 has the embedding folded into the per-tap tables T_k = emb @ W1_k^T.
    h1 = conv3_relu(one_hot, t1_ref, b1_ref)                   # (M, C1) f32
    h2 = conv3_relu(h1.astype(jnp.bfloat16), w2_ref, b2_ref)   # (M, C2) f32

    # ---- Mean-pool over L: reshape keeps the lane dim (C2) untouched, sum is
    # a cheap sublane reduction, 1/L scale stays in f32.
    pooled = jnp.sum(h2.reshape(tb, L, c2), axis=1) * (1.0 / L)   # (TB, C2) f32

    # ---- Classifier head; lane-dense (TB, V) output block.
    logits = jnp.dot(pooled.astype(jnp.bfloat16), wf_ref[...],
                     preferred_element_type=jnp.float32)
    out_ref[...] = logits + bf_ref[...]


def spellcheck_forward(idx, emb, w1_t, b1, w2_t, b2, wf, bf, *, tb=None):
    """idx: (B, L) int char ids.  Torch-layout conv weights w*_t: (OC, IC, 3)."""
    B, L = idx.shape
    char_v, E = emb.shape
    C1 = w1_t.shape[0]
    C2 = w2_t.shape[0]
    V = wf.shape[1]

    # Sequences per grid step: aim for ~4096 packed rows per step (feeds the
    # MXU, fits v7x's 64 MiB VMEM with headroom; v5e/v6e have more), but never
    # pad a small batch beyond the next multiple of 8.
    if tb is None:
        tb = max(8, -(-4096 // L))
    tb = -(-tb // 8) * 8
    tb = max(8, min(tb, -(-B // 8) * 8))
    Bpad = -(-B // tb) * tb

    # Pad batch with all-zero (padding char) sequences; results are discarded.
    idx_p = jnp.zeros((Bpad, L), jnp.int32).at[:B].set(idx.astype(jnp.int32))

    # Fold the embedding into conv1: per-tap tables T_k = emb @ W1[:, :, k]^T,
    # shape (char_v, C1); tap k multiplies x[t + k - 1]. padding_idx=0 comes
    # from embedding row 0 being zero.
    emb_f = emb.astype(jnp.float32)
    t1 = jnp.stack([emb_f @ w1_t[:, :, k].astype(jnp.float32).T
                    for k in range(3)], axis=0)               # (3, char_v, C1)
    w2 = jnp.stack([w2_t[:, :, k].astype(jnp.float32).T
                    for k in range(3)], axis=0)                # (3, C1, C2)

    out = pl.pallas_call(
        spellcheck_kernel,
        out_shape=jax.ShapeDtypeStruct((Bpad, V), jnp.float32),
        grid_spec=pltpu.PrefetchScalarGridSpec(
            num_scalar_prefetch=0,
            grid=(Bpad // tb,),
            in_specs=[
                pl.BlockSpec((tb, L), lambda g: (g, 0)),             # char ids
                pl.BlockSpec((3, char_v, C1), lambda g: (0, 0, 0)),  # emb-folded conv1 taps
                pl.BlockSpec((1, C1), lambda g: (0, 0)),             # conv1 bias
                pl.BlockSpec((3, C1, C2), lambda g: (0, 0, 0)),      # conv2 taps
                pl.BlockSpec((1, C2), lambda g: (0, 0)),             # conv2 bias
                pl.BlockSpec((C2, V), lambda g: (0, 0)),             # fc weight
                pl.BlockSpec((1, V), lambda g: (0, 0)),              # fc bias
            ],
            out_specs=pl.BlockSpec((tb, V), lambda g: (g, 0)),
        ),
        compiler_params=pltpu.CompilerParams(
            dimension_semantics=("parallel",),
            vmem_limit_bytes=56 * 1024 * 1024),
    )(idx_p,
      t1.astype(jnp.bfloat16),
      b1.reshape(1, C1).astype(jnp.float32),
      w2.astype(jnp.bfloat16),
      b2.reshape(1, C2).astype(jnp.float32),
      wf.astype(jnp.bfloat16),
      bf.reshape(1, V).astype(jnp.float32))
    return out[:B]


def ref_forward(idx, emb, w1_t, b1, w2_t, b2, wf, bf):
    """Pure-JAX f32 reference, mirrors the PyTorch forward exactly (NCL convs)."""
    x = emb[idx]                           # (B, L, E)
    x = jnp.transpose(x, (0, 2, 1))        # (B, E, L)

    def conv(h, w, b):
        y = jax.lax.conv_general_dilated(
            h, w, window_strides=(1,), padding=((1, 1),),
            dimension_numbers=('NCH', 'OIH', 'NCH'))
        return jnp.maximum(y + b[None, :, None], 0.0)

    h1 = conv(x, w1_t, b1)                 # (B, 128, L)
    h2 = conv(h1, w2_t, b2)                # (B, 256, L)
    pooled = jnp.mean(h2, axis=2)          # (B, 256)
    return pooled @ wf + bf


if __name__ == "__main__":
    # Small, deterministic setup consistent with the module defaults.
    B, L = 2, 16
    char_vocab, emb_dim = 128, 64
    c1, c2 = 128, 256
    vocab_size = 256

    key = jax.random.PRNGKey(0)
    ks = jax.random.split(key, 8)

    emb = 0.02 * jax.random.normal(ks[0], (char_vocab, emb_dim), jnp.float32)
    emb = emb.at[0].set(0.0)                                   # padding_idx=0
    w1_t = 0.05 * jax.random.normal(ks[1], (c1, emb_dim, 3), jnp.float32)
    b1 = 0.01 * jax.random.normal(ks[2], (c1,), jnp.float32)
    w2_t = 0.05 * jax.random.normal(ks[3], (c2, c1, 3), jnp.float32)
    b2 = 0.01 * jax.random.normal(ks[4], (c2,), jnp.float32)
    wf = 0.05 * jax.random.normal(ks[5], (c2, vocab_size), jnp.float32)
    bf = 0.01 * jax.random.normal(ks[6], (vocab_size,), jnp.float32)

    idx = jax.random.randint(ks[7], (B, L), 0, char_vocab, jnp.int32)
    idx = idx.at[:, -2:].set(0)            # include some padding tokens

    out = jax.block_until_ready(
        spellcheck_forward(idx, emb, w1_t, b1, w2_t, b2, wf, bf))

    ref = ref_forward(idx, emb, w1_t, b1, w2_t, b2, wf, bf)
    # bf16 MXU operands (incl. the folded emb@W1 tables) with f32 accumulation.
    np.testing.assert_allclose(np.asarray(out), np.asarray(ref),
                               rtol=2e-2, atol=1e-3)
    print("KERNEL_OK")
</pallas_src>

<mosaic_0001>
module attributes {stable_mosaic.version = 11 : i64} {
  func.func @spellcheck_kernel(%arg0: i32, %arg1: memref<8x16xi32, #tpu.memory_space<vmem>>, %arg2: memref<3x128x128xbf16, #tpu.memory_space<vmem>>, %arg3: memref<1x128xf32, #tpu.memory_space<vmem>>, %arg4: memref<3x128x256xbf16, #tpu.memory_space<vmem>>, %arg5: memref<1x256xf32, #tpu.memory_space<vmem>>, %arg6: memref<256x256xbf16, #tpu.memory_space<vmem>>, %arg7: memref<1x256xf32, #tpu.memory_space<vmem>>, %arg8: memref<8x256xf32, #tpu.memory_space<vmem>>) attributes {dimension_semantics = [#tpu.dimension_semantics<parallel>], iteration_bounds = array<i64: 1>, scalar_prefetch = 0 : i64, scratch_operands = 0 : i64, tpu.core_type = #tpu.core_type<tc>, window_params = [{transform_indices = @transform_0, window_bounds = array<i64: 8, 16>}, {pipeline_mode = #tpu.pipeline_mode<synchronous>, transform_indices = @transform_1, window_bounds = array<i64: 3, 128, 128>}, {pipeline_mode = #tpu.pipeline_mode<synchronous>, transform_indices = @transform_2, window_bounds = array<i64: 1, 128>}, {pipeline_mode = #tpu.pipeline_mode<synchronous>, transform_indices = @transform_3, window_bounds = array<i64: 3, 128, 256>}, {pipeline_mode = #tpu.pipeline_mode<synchronous>, transform_indices = @transform_4, window_bounds = array<i64: 1, 256>}, {pipeline_mode = #tpu.pipeline_mode<synchronous>, transform_indices = @transform_5, window_bounds = array<i64: 256, 256>}, {pipeline_mode = #tpu.pipeline_mode<synchronous>, transform_indices = @transform_6, window_bounds = array<i64: 1, 256>}, {transform_indices = @transform_7, window_bounds = array<i64: 8, 256>}]} {
    %c0 = arith.constant 0 : index
    %c0_0 = arith.constant 0 : index
    %0 = vector.load %arg1[%c0, %c0_0] : memref<8x16xi32, #tpu.memory_space<vmem>>, vector<8x16xi32>
    %1 = tpu.iota {dimensions = array<i32: 2>} : vector<8x16x128xi32>
    %2 = vector.shape_cast %0 : vector<8x16xi32> to vector<8x16x1xi32>
    %3 = vector.broadcast %2 : vector<8x16x1xi32> to vector<8x16x128xi32>
    %4 = arith.cmpi eq, %1, %3 : vector<8x16x128xi32>
    %5 = arith.extui %4 : vector<8x16x128xi1> to vector<8x16x128xi32>
    %6 = arith.sitofp %5 : vector<8x16x128xi32> to vector<8x16x128xf32>
    %7 = arith.truncf %6 : vector<8x16x128xf32> to vector<8x16x128xbf16>
    %8 = vector.shape_cast %7 : vector<8x16x128xbf16> to vector<128x128xbf16>
    %9 = tpu.iota {dimensions = array<i32: 1>} : vector<8x16x1xi32>
    %10 = vector.shape_cast %9 : vector<8x16x1xi32> to vector<128x1xi32>
    %c0_i32 = arith.constant 0 : i32
    %11 = vector.broadcast %c0_i32 : i32 to vector<128x1xi32>
    %12 = arith.cmpi ne, %10, %11 : vector<128x1xi32>
    %13 = arith.extui %12 : vector<128x1xi1> to vector<128x1xi32>
    %14 = arith.sitofp %13 : vector<128x1xi32> to vector<128x1xf32>
    %c15_i32 = arith.constant 15 : i32
    %15 = vector.broadcast %c15_i32 : i32 to vector<128x1xi32>
    %16 = arith.cmpi ne, %10, %15 : vector<128x1xi32>
    %17 = arith.extui %16 : vector<128x1xi1> to vector<128x1xi32>
    %18 = arith.sitofp %17 : vector<128x1xi32> to vector<128x1xf32>
    %c0_1 = arith.constant 0 : index
    %c0_2 = arith.constant 0 : index
    %c0_3 = arith.constant 0 : index
    %19 = vector.load %arg2[%c0_1, %c0_2, %c0_3] : memref<3x128x128xbf16, #tpu.memory_space<vmem>>, vector<1x128x128xbf16>
    %20 = vector.shape_cast %19 : vector<1x128x128xbf16> to vector<128x128xbf16>
    %cst = arith.constant dense<0.000000e+00> : vector<128x128xf32>
    %21 = tpu.matmul %8, %20, %cst {dimension_numbers = #tpu.dot_dimension_numbers<[1], [0], [0], [1], [0, 0, 1, 1], [], []>} : vector<128x128xbf16>, vector<128x128xbf16>, vector<128x128xf32> -> vector<128x128xf32>
    %c1 = arith.constant 1 : index
    %c0_4 = arith.constant 0 : index
    %c0_5 = arith.constant 0 : index
    %22 = vector.load %arg2[%c1, %c0_4, %c0_5] : memref<3x128x128xbf16, #tpu.memory_space<vmem>>, vector<1x128x128xbf16>
    %23 = vector.shape_cast %22 : vector<1x128x128xbf16> to vector<128x128xbf16>
    %cst_6 = arith.constant dense<0.000000e+00> : vector<128x128xf32>
    %24 = tpu.matmul %8, %23, %cst_6 {dimension_numbers = #tpu.dot_dimension_numbers<[1], [0], [0], [1], [0, 0, 1, 1], [], []>} : vector<128x128xbf16>, vector<128x128xbf16>, vector<128x128xf32> -> vector<128x128xf32>
    %c2 = arith.constant 2 : index
    %c0_7 = arith.constant 0 : index
    %c0_8 = arith.constant 0 : index
    %25 = vector.load %arg2[%c2, %c0_7, %c0_8] : memref<3x128x128xbf16, #tpu.memory_space<vmem>>, vector<1x128x128xbf16>
    %26 = vector.shape_cast %25 : vector<1x128x128xbf16> to vector<128x128xbf16>
    %cst_9 = arith.constant dense<0.000000e+00> : vector<128x128xf32>
    %27 = tpu.matmul %8, %26, %cst_9 {dimension_numbers = #tpu.dot_dimension_numbers<[1], [0], [0], [1], [0, 0, 1, 1], [], []>} : vector<128x128xbf16>, vector<128x128xbf16>, vector<128x128xf32> -> vector<128x128xf32>
    %c1_i32 = arith.constant 1 : i32
    %28 = tpu.dynamic_rotate %21 by %c1_i32 dim 0 : vector<128x128xf32>, i32 -> vector<128x128xf32>
    %29 = vector.broadcast %14 : vector<128x1xf32> to vector<128x128xf32>
    %30 = arith.mulf %29, %28 : vector<128x128xf32>
    %31 = arith.addf %24, %30 : vector<128x128xf32>
    %c127_i32 = arith.constant 127 : i32
    %32 = tpu.dynamic_rotate %27 by %c127_i32 dim 0 : vector<128x128xf32>, i32 -> vector<128x128xf32>
    %33 = vector.broadcast %18 : vector<128x1xf32> to vector<128x128xf32>
    %34 = arith.mulf %33, %32 : vector<128x128xf32>
    %35 = arith.addf %31, %34 : vector<128x128xf32>
    %c0_10 = arith.constant 0 : index
    %c0_11 = arith.constant 0 : index
    %36 = vector.load %arg3[%c0_10, %c0_11] : memref<1x128xf32, #tpu.memory_space<vmem>>, vector<1x128xf32>
    %37 = vector.broadcast %36 : vector<1x128xf32> to vector<128x128xf32>
    %38 = arith.addf %35, %37 : vector<128x128xf32>
    %cst_12 = arith.constant 0.000000e+00 : f32
    %39 = vector.broadcast %cst_12 : f32 to vector<128x128xf32>
    %40 = arith.maximumf %38, %39 : vector<128x128xf32>
    %41 = arith.truncf %40 : vector<128x128xf32> to vector<128x128xbf16>
    %c0_13 = arith.constant 0 : index
    %c0_14 = arith.constant 0 : index
    %c0_15 = arith.constant 0 : index
    %42 = vector.load %arg4[%c0_13, %c0_14, %c0_15] : memref<3x128x256xbf16, #tpu.memory_space<vmem>>, vector<1x128x256xbf16>
    %43 = vector.shape_cast %42 : vector<1x128x256xbf16> to vector<128x256xbf16>
    %cst_16 = arith.constant dense<0.000000e+00> : vector<128x256xf32>
    %44 = tpu.matmul %41, %43, %cst_16 {dimension_numbers = #tpu.dot_dimension_numbers<[1], [0], [0], [1], [0, 0, 1, 1], [], []>} : vector<128x128xbf16>, vector<128x256xbf16>, vector<128x256xf32> -> vector<128x256xf32>
    %c1_17 = arith.constant 1 : index
    %c0_18 = arith.constant 0 : index
    %c0_19 = arith.constant 0 : index
    %45 = vector.load %arg4[%c1_17, %c0_18, %c0_19] : memref<3x128x256xbf16, #tpu.memory_space<vmem>>, vector<1x128x256xbf16>
    %46 = vector.shape_cast %45 : vector<1x128x256xbf16> to vector<128x256xbf16>
    %cst_20 = arith.constant dense<0.000000e+00> : vector<128x256xf32>
    %47 = tpu.matmul %41, %46, %cst_20 {dimension_numbers = #tpu.dot_dimension_numbers<[1], [0], [0], [1], [0, 0, 1, 1], [], []>} : vector<128x128xbf16>, vector<128x256xbf16>, vector<128x256xf32> -> vector<128x256xf32>
    %c2_21 = arith.constant 2 : index
    %c0_22 = arith.constant 0 : index
    %c0_23 = arith.constant 0 : index
    %48 = vector.load %arg4[%c2_21, %c0_22, %c0_23] : memref<3x128x256xbf16, #tpu.memory_space<vmem>>, vector<1x128x256xbf16>
    %49 = vector.shape_cast %48 : vector<1x128x256xbf16> to vector<128x256xbf16>
    %cst_24 = arith.constant dense<0.000000e+00> : vector<128x256xf32>
    %50 = tpu.matmul %41, %49, %cst_24 {dimension_numbers = #tpu.dot_dimension_numbers<[1], [0], [0], [1], [0, 0, 1, 1], [], []>} : vector<128x128xbf16>, vector<128x256xbf16>, vector<128x256xf32> -> vector<128x256xf32>
    %c1_i32_25 = arith.constant 1 : i32
    %51 = tpu.dynamic_rotate %44 by %c1_i32_25 dim 0 : vector<128x256xf32>, i32 -> vector<128x256xf32>
    %52 = vector.broadcast %14 : vector<128x1xf32> to vector<128x256xf32>
    %53 = arith.mulf %52, %51 : vector<128x256xf32>
    %54 = arith.addf %47, %53 : vector<128x256xf32>
    %c127_i32_26 = arith.constant 127 : i32
    %55 = tpu.dynamic_rotate %50 by %c127_i32_26 dim 0 : vector<128x256xf32>, i32 -> vector<128x256xf32>
    %56 = vector.broadcast %18 : vector<128x1xf32> to vector<128x256xf32>
    %57 = arith.mulf %56, %55 : vector<128x256xf32>
    %58 = arith.addf %54, %57 : vector<128x256xf32>
    %c0_27 = arith.constant 0 : index
    %c0_28 = arith.constant 0 : index
    %59 = vector.load %arg5[%c0_27, %c0_28] : memref<1x256xf32, #tpu.memory_space<vmem>>, vector<1x256xf32>
    %60 = vector.broadcast %59 : vector<1x256xf32> to vector<128x256xf32>
    %61 = arith.addf %58, %60 : vector<128x256xf32>
    %cst_29 = arith.constant 0.000000e+00 : f32
    %62 = vector.broadcast %cst_29 : f32 to vector<128x256xf32>
    %63 = arith.maximumf %61, %62 : vector<128x256xf32>
    %64 = vector.shape_cast %63 : vector<128x256xf32> to vector<8x16x256xf32>
    %cst_30 = arith.constant dense<0.000000e+00> : vector<8x256xf32>
    %65 = vector.multi_reduction <add>, %64, %cst_30 [1] : vector<8x16x256xf32> to vector<8x256xf32>
    %cst_31 = arith.constant 6.250000e-02 : f32
    %66 = vector.broadcast %cst_31 : f32 to vector<8x256xf32>
    %67 = arith.mulf %65, %66 : vector<8x256xf32>
    %68 = arith.truncf %67 : vector<8x256xf32> to vector<8x256xbf16>
    %c0_32 = arith.constant 0 : index
    %c0_33 = arith.constant 0 : index
    %69 = vector.load %arg6[%c0_32, %c0_33] : memref<256x256xbf16, #tpu.memory_space<vmem>>, vector<256x256xbf16>
    %cst_34 = arith.constant dense<0.000000e+00> : vector<8x256xf32>
    %70 = tpu.matmul %68, %69, %cst_34 {dimension_numbers = #tpu.dot_dimension_numbers<[1], [0], [0], [1], [0, 0, 1, 1], [], []>} : vector<8x256xbf16>, vector<256x256xbf16>, vector<8x256xf32> -> vector<8x256xf32>
    %c0_35 = arith.constant 0 : index
    %c0_36 = arith.constant 0 : index
    %71 = vector.load %arg7[%c0_35, %c0_36] : memref<1x256xf32, #tpu.memory_space<vmem>>, vector<1x256xf32>
    %72 = vector.broadcast %71 : vector<1x256xf32> to vector<8x256xf32>
    %73 = arith.addf %70, %72 : vector<8x256xf32>
    %c0_37 = arith.constant 0 : index
    %c0_38 = arith.constant 0 : index
    %74 = vector.load %arg8[%c0_37, %c0_38] : memref<8x256xf32, #tpu.memory_space<vmem>>, vector<8x256xf32>
    tpu.vector_store %arg8[%c0_37, %c0_38], %73 {strides = array<i32>} : memref<8x256xf32, #tpu.memory_space<vmem>>, vector<8x256xf32>,
    return
  }
  func.func @transform_0(%arg0: i32) -> (i32, i32) {
    %c0_i32 = arith.constant 0 : i32
    %c0_i32_0 = arith.constant 0 : i32
    return %arg0, %c0_i32 : i32, i32
  }
  func.func @transform_1(%arg0: i32) -> (i32, i32, i32) {
    %c0_i32 = arith.constant 0 : i32
    %c0_i32_0 = arith.constant 0 : i32
    %c0_i32_1 = arith.constant 0 : i32
    %c0_i32_2 = arith.constant 0 : i32
    return %c0_i32, %c0_i32_0, %c0_i32_1 : i32, i32, i32
  }
  func.func @transform_2(%arg0: i32) -> (i32, i32) {
    %c0_i32 = arith.constant 0 : i32
    %c0_i32_0 = arith.constant 0 : i32
    %c0_i32_1 = arith.constant 0 : i32
    return %c0_i32, %c0_i32_0 : i32, i32
  }
  func.func @transform_3(%arg0: i32) -> (i32, i32, i32) {
    %c0_i32 = arith.constant 0 : i32
    %c0_i32_0 = arith.constant 0 : i32
    %c0_i32_1 = arith.constant 0 : i32
    %c0_i32_2 = arith.constant 0 : i32
    return %c0_i32, %c0_i32_0, %c0_i32_1 : i32, i32, i32
  }
  func.func @transform_4(%arg0: i32) -> (i32, i32) {
    %c0_i32 = arith.constant 0 : i32
    %c0_i32_0 = arith.constant 0 : i32
    %c0_i32_1 = arith.constant 0 : i32
    return %c0_i32, %c0_i32_0 : i32, i32
  }
  func.func @transform_5(%arg0: i32) -> (i32, i32) {
    %c0_i32 = arith.constant 0 : i32
    %c0_i32_0 = arith.constant 0 : i32
    %c0_i32_1 = arith.constant 0 : i32
    return %c0_i32, %c0_i32_0 : i32, i32
  }
  func.func @transform_6(%arg0: i32) -> (i32, i32) {
    %c0_i32 = arith.constant 0 : i32
    %c0_i32_0 = arith.constant 0 : i32
    %c0_i32_1 = arith.constant 0 : i32
    return %c0_i32, %c0_i32_0 : i32, i32
  }
  func.func @transform_7(%arg0: i32) -> (i32, i32) {
    %c0_i32 = arith.constant 0 : i32
    %c0_i32_0 = arith.constant 0 : i32
    return %arg0, %c0_i32 : i32, i32
  }
}

</mosaic_0001>

<bundles_post_ra>
// kernel: tpu_custom_call.1
= control target key start
LH: loop header
LB: loop body
LE: loop exit
PB: predicated region body
PF: predicated region fallthrough
CT: control target
= control target key end

     0   :  { %12 = vsyncpa [#allocation3], 0  ;;  %s3945_s0 = inlined_call_operand.hbm [shape: s32[8,16], index: 0, kind: input, shape index: {}]   ;;  %s3946_s1 = inlined_call_operand.hbm [shape: bf16[3,128,128], index: 1, kind: input, shape index: {}]   ;;  %s3947_s2 = inlined_call_operand.vmem [shape: f32[1,128], index: 2, kind: input, shape index: {}]   ;;  %s3948_s3 = inlined_call_operand.hbm [shape: bf16[3,128,256], index: 3, kind: input, shape index: {}]   ;;  %s3949_s4 = inlined_call_operand.vmem [shape: f32[1,256], index: 4, kind: input, shape index: {}]   ;;  %s3950_s5 = inlined_call_operand.hbm [shape: bf16[256,256], index: 5, kind: input, shape index: {}]   ;;  %s3951_s6 = inlined_call_operand.vmem [shape: f32[1,256], index: 6, kind: input, shape index: {}]   ;;  %s3952_s7 = inlined_call_operand.hbm [shape: f32[8,256], index: 7, kind: output, shape index: {}]  }
   0x1   :  { %13 = vsyncpa [#allocation6], 0 }
   0x2   :  { %14 = vsyncpa [#allocation9], 0 }
   0x3   :  { %15 = vsyncpa [#allocation4], 0  ;;  %s2862_s24 = smov [#allocation5]  }
   0x4   :  { %s31_s25 = sshll.u32 %s2862_s24, 4  ;;  %s32_s25 = int_to_ptr.vmem [resolvable:$true] %s31_s25 }
   0x5   :  { %s2762_s26 = scalar_lea.vmem %s32_s25, 3072  ;;  %p2767_p1 = scmp.lt.s32.totalorder %s32_s25, %s32_s25 }
   0x6   :  { %p2763_p0 = scmp.ne.s32.totalorder %s32_s25, %s2762_s26  ;;  %p2768_p2 = scmp.lt.s32.totalorder %s2762_s26, %s2762_s26 }
   0x8   :  { %p2769_p3 = por %p2768_p2, %p2767_p1 }
   0xa   :  { %p2770_p4 = pnand %p2769_p3, %p2763_p0 }
   0xc   :  { %2773 = shalt.err (!%p2770_p4)
}
   0xd   :  { %s2863_s27 = smov 64   ;;  %s2864_s28 = smov 4  }
   0xe   :  { %37 = dma.hbm_to_vmem [thread:$0]  %s3946_s1, 3072, %s32_s25, [#allocation6], %s2863_s27, %s2863_s27, %s2864_s28  }
   0xf   :  { %s2865_s8 = smov [#allocation2]   ;;  %s2866_s10 = smov [#allocation7]  }
  0x10   :  { %s22_s9 = sshll.u32 %s2865_s8, 4  ;;  %s45_s11 = sshll.u32 %s2866_s10, 4  ;;  %s23_s9 = int_to_ptr.vmem [resolvable:$true] %s22_s9  ;;  %s46_s11 = int_to_ptr.vmem [resolvable:$true] %s45_s11 }
  0x11   :  { %s2782_s12 = scalar_lea.vmem %s23_s9, 128  ;;  %p2787_p6 = scmp.lt.s32.totalorder %s23_s9, %s23_s9 }
  0x12   :  { %p2783_p5 = scmp.ne.s32.totalorder %s23_s9, %s2782_s12  ;;  %p2788_p7 = scmp.lt.s32.totalorder %s2782_s12, %s2782_s12 }
  0x14   :  { %p2789_p8 = por %p2788_p7, %p2787_p6 }
  0x16   :  { %p2790_p9 = pnand %p2789_p8, %p2783_p5 }
  0x18   :  { %2793 = shalt.err (!%p2790_p9)
}
  0x19   :  { %25 = dma.hbm_to_vmem [thread:$0]  %s3945_s0, 128, %s23_s9, [#allocation3]  }
  0x1a   :  { %s2802_s15 = scalar_lea.vmem %s46_s11, 6144  ;;  %p2807_p11 = scmp.lt.s32.totalorder %s46_s11, %s46_s11 }
  0x1b   :  { %p2803_p10 = scmp.ne.s32.totalorder %s46_s11, %s2802_s15  ;;  %p2808_p12 = scmp.lt.s32.totalorder %s2802_s15, %s2802_s15 }
  0x1d   :  { %p2809_p13 = por %p2808_p12, %p2807_p11 }
  0x1f   :  { %p2810_p0 = pnand %p2809_p13, %p2803_p10 }
  0x21   :  { %2813 = shalt.err (!%p2810_p0)
}
  0x22   :  { %s2867_s1 = smov 128   ;;  %s2868_s16 = smov 8  }
  0x23   :  { %51 = dma.hbm_to_vmem [thread:$0]  %s3948_s3, 6144, %s46_s11, [#allocation6], %s2867_s1, %s2867_s1, %s2868_s16  }
  0x24   :  { %s2869_s19 = smov [#allocation8]  }
  0x25   :  { %s59_s20 = sshll.u32 %s2869_s19, 4  ;;  %s60_s20 = int_to_ptr.vmem [resolvable:$true] %s59_s20 }
  0x26   :  { %s2822_s21 = scalar_lea.vmem %s60_s20, 4096  ;;  %p2827_p2 = scmp.lt.s32.totalorder %s60_s20, %s60_s20 }
  0x27   :  { %p2823_p1 = scmp.ne.s32.totalorder %s60_s20, %s2822_s21  ;;  %p2828_p3 = scmp.lt.s32.totalorder %s2822_s21, %s2822_s21 }
  0x29   :  { %p2829_p4 = por %p2828_p3, %p2827_p2 }
  0x2b   :  { %p2830_p5 = pnand %p2829_p4, %p2823_p1 }
  0x2d   :  { %2833 = shalt.err (!%p2830_p5)
}
  0x2e   :  { %65 = dma.hbm_to_vmem [thread:$0]  %s3950_s5, 4096, %s60_s20, [#allocation9], %s2867_s1, %s2867_s1, %s2868_s16  }
  0x2f   :  { %2854 = dma.done.wait [#allocation3], 128  }
  0x30   :  { %2855 = vsyncadd [#allocation3], 4294967168 }
  0x31   :  { %2856 = dma.done.wait [#allocation6], 9216  }
  0x32   :  { %2857 = vsyncadd [#allocation6], 4294958080 }
  0x33   :  { %2858 = dma.done.wait [#allocation9], 4096  }
  0x34   :  { %2859 = vsyncadd [#allocation9], 4294963200  ;;  %v82_v0 = vlaneseq  ;;  %v2935_v4 = vld [vmem:[#allocation2] sm:$0xff]  ;;  %v2612_v10 = vld [vmem:[#allocation5 + $0x30] sm:$0xff]   ;;  %v2870_v44 = vmov 1.0|1.0  }
  0x35   :  { %v2610_v7 = vld [vmem:[#allocation5 + $0x38] sm:$0xff]   ;;  %v2613_v11 = vld [vmem:[#allocation5 + $0xb0] sm:$0xff]   ;;  %v2614_v12 = vld [vmem:[#allocation5 + $0x28] sm:$0xff]   ;;  %s2873_s25 = smov [#allocation10]  }
  0x36   :  { %v2927_v1 = vshrl.u32 %v82_v0, 7  ;;  %v2611_v9 = vld [vmem:[#allocation5 + $0xb8] sm:$0xff]   ;;  %2502 = vmatprep.subr.bf16.mxu0 %v2610_v7  ;;  %v2615_v13 = vld [vmem:[#allocation5 + $0xa8] sm:$0xff]   ;;  %v2616_v16 = vld [vmem:[#allocation5 + $0x20] sm:$0xff]   ;;  %v2954_v38 = vand.u32 127, %v82_v0  ;;  %s2272_s26 = sshll.u32 %s2873_s25, 4  ;;  %s2273_s26 = int_to_ptr.vmem [resolvable:$true] %s2272_s26 }
  0x37   :  { %2534 = vmatprep.subr.bf16.mxu1 %v2611_v9  ;;  %2503 = vmatpush3.bf16.msra.mxu0 %v2610_v7  ;;  %v2617_v17 = vld [vmem:[#allocation5 + $0xa0] sm:$0xff]   ;;  %v2618_v20 = vld [vmem:[#allocation5 + $0x18] sm:$0xff]   ;;  %v2620_v24 = vld [vmem:[#allocation5 + $0x10] sm:$0xff]   ;;  %s2834_s27 = scalar_lea.vmem %s2273_s26, 256  ;;  %p2839_p7 = scmp.lt.s32.totalorder %s2273_s26, %s2273_s26 }
  0x38   :  { %v2930_v2 = vsub.s32 1, %v2927_v1  ;;  %v2933_v3 = vsub.s32 0, %v2927_v1  ;;  %v108_v8 = vsub.s32 2, %v2927_v1  ;;  %2535 = vmatpush3.bf16.msra.mxu1 %v2611_v9  ;;  %2504 = vmatprep.subr.bf16.mxu0 %v2612_v10  ;;  %v119_v15 = vsub.s32 3, %v2927_v1  ;;  %v2619_v21 = vld [vmem:[#allocation5 + $0x98] sm:$0xff]   ;;  %v2621_v25 = vld [vmem:[#allocation5 + $0x90] sm:$0xff]   ;;  %p2835_p6 = scmp.ne.s32.totalorder %s2273_s26, %s2834_s27  ;;  %p2840_p8 = scmp.lt.s32.totalorder %s2834_s27, %s2834_s27 }
  0x39   :  { %2536 = vmatprep.subr.bf16.mxu1 %v2613_v11  ;;  %v130_v19 = vsub.s32 4, %v2927_v1  ;;  %v141_v23 = vsub.s32 5, %v2927_v1  ;;  %v152_v27 = vsub.s32 6, %v2927_v1  ;;  %v2622_v28 = vld [vmem:[#allocation5 + $0x8] sm:$0xff]   ;;  %v163_v31 = vsub.s32 7, %v2927_v1  ;;  %v2624_v32 = vld [vmem:[#allocation5] sm:$0xff]  }
  0x3a   :  { %3958 = vst [vmem:[#allocation15_spill] sm:$0xff] %v2930_v2  ;;  %3959 = vst [vmem:[#allocation16_spill] sm:$0xff] %v2933_v3  ;;  %v98_v5 = vrot.slane %v2935_v4, %v2930_v2  ;;  %v87_v6 = vrot.slane %v2935_v4, %v2933_v3  ;;  %v109_v14 = vrot.slane %v2935_v4, %v108_v8  ;;  %v2623_v29 = vld [vmem:[#allocation5 + $0x88] sm:$0xff]   ;;  %v2625_v33 = vld [vmem:[#allocation5 + $0x80] sm:$0xff]   ;;  %p2841_p9 = por %p2840_p8, %p2839_p7 }
  0x3b   :  { %2505 = vmatpush3.bf16.msra.mxu0 %v2612_v10  ;;  %v120_v18 = vrot.slane %v2935_v4, %v119_v15  ;;  %v131_v22 = vrot.slane %v2935_v4, %v130_v19  ;;  %v142_v26 = vrot.slane %v2935_v4, %v141_v23  ;;  %v153_v30 = vrot.slane %v2935_v4, %v152_v27  ;;  %v2626_v35 = vld [vmem:[#allocation5 + $0x78] sm:$0xff]   ;;  %v2627_v43 = vld [vmem:[#allocation5 + $0x70] sm:$0xff]   ;;  %v2628_v48 = vld [vmem:[#allocation5 + $0x68] sm:$0xff]  }
  0x3c   :  { %100 = vbcast.lane.b32.xlu1 %v98_v5, 256  ;;  %89 = vbcast.lane.b32.xlu0 %v87_v6, 256  ;;  %v164_v34 = vrot.slane %v2935_v4, %v163_v31  ;;  %v2629_v52 = vld [vmem:[#allocation5 + $0x60] sm:$0xff]   ;;  %v2630_v56 = vld [vmem:[#allocation5 + $0x58] sm:$0xff]   ;;  %v2631_v60 = vld [vmem:[#allocation5 + $0x50] sm:$0xff]   ;;  %p2842_p10 = pnand %p2841_p9, %p2835_p6 }
  0x3d   :  { %2537 = vmatpush3.bf16.msra.mxu1 %v2613_v11  ;;  %2506 = vmatprep.subr.bf16.mxu0 %v2614_v12  ;;  %v2632_v0 = vld [vmem:[#allocation5 + $0x48] sm:$0xff]   ;;  %v2636_v7 = vld [vmem:[#allocation7 + $0x74] ss:$8 sps:$4 sm:$0xff]   ;;  %v2634_v9 = vld [vmem:[#allocation7 + $0x70] ss:$8 sps:$4 sm:$0xff]  }
  0x3e   :  { %2538 = vmatprep.subr.bf16.mxu1 %v2615_v13  ;;  %v2639_v8 = vld [vmem:[#allocation7 + $0x174] ss:$8 sps:$4 sm:$0xff]   ;;  %v2637_v10 = vld [vmem:[#allocation7 + $0x170] ss:$8 sps:$4 sm:$0xff]   ;;  %v2642_v11 = vld [vmem:[#allocation7 + $0x64] ss:$8 sps:$4 sm:$0xff]  }
  0x3f   :  { %2507 = vmatpush3.bf16.msra.mxu0 %v2614_v12  ;;  %v2645_v12 = vld [vmem:[#allocation7 + $0x164] ss:$8 sps:$4 sm:$0xff]   ;;  %v2648_v15 = vld [vmem:[#allocation7 + $0x54] ss:$8 sps:$4 sm:$0xff]  }
  0x40   :  { %104 = vbcast.lane.b32.xlu1 %v98_v5, 264  ;;  %93 = vbcast.lane.b32.xlu0 %v87_v6, 264  ;;  %v2633_v6 = vld [vmem:[#allocation5 + $0x40] sm:$0xff]   ;;  %v2660_v23 = vld [vmem:[#allocation7 + $0x34] ss:$8 sps:$4 sm:$0xff]  }
  0x41   :  { %2539 = vmatpush3.bf16.msra.mxu1 %v2615_v13  ;;  %2508 = vmatprep.subr.bf16.mxu0 %v2616_v16  ;;  %v2640_v13 = vld [vmem:[#allocation7 + $0x60] ss:$8 sps:$4 sm:$0xff]   ;;  %v2654_v19 = vld [vmem:[#allocation7 + $0x44] ss:$8 sps:$4 sm:$0xff]   ;;  %v2672_v31 = vld [vmem:[#allocation7 + $0x14] ss:$8 sps:$4 sm:$0xff]  }
  0x42   :  { %2540 = vmatprep.subr.bf16.mxu1 %v2617_v17  ;;  %v2666_v27 = vld [vmem:[#allocation7 + $0x24] ss:$8 sps:$4 sm:$0xff]  }
  0x43   :  { %2509 = vmatpush3.bf16.msra.mxu0 %v2616_v16  ;;  %v2651_v16 = vld [vmem:[#allocation7 + $0x154] ss:$8 sps:$4 sm:$0xff]  }
  0x44   :  { %115 = vbcast.lane.b32.xlu1 %v109_v14, 264  ;;  %111 = vbcast.lane.b32.xlu0 %v109_v14, 256  ;;  %v2643_v14 = vld [vmem:[#allocation7 + $0x160] ss:$8 sps:$4 sm:$0xff]  }
  0x45   :  { %2541 = vmatpush3.bf16.msra.mxu1 %v2617_v17  ;;  %2510 = vmatprep.subr.bf16.mxu0 %v2618_v20  ;;  %v2646_v17 = vld [vmem:[#allocation7 + $0x50] ss:$8 sps:$4 sm:$0xff]  }
  0x46   :  { %2542 = vmatprep.subr.bf16.mxu1 %v2619_v21 }
  0x47   :  { %2511 = vmatpush3.bf16.msra.mxu0 %v2618_v20  ;;  %v2657_v20 = vld [vmem:[#allocation7 + $0x144] ss:$8 sps:$4 sm:$0xff]  }
  0x48   :  { %126 = vbcast.lane.b32.xlu1 %v120_v18, 264  ;;  %122 = vbcast.lane.b32.xlu0 %v120_v18, 256  ;;  %v2649_v18 = vld [vmem:[#allocation7 + $0x150] ss:$8 sps:$4 sm:$0xff]  }
  0x49   :  { %2543 = vmatpush3.bf16.msra.mxu1 %v2619_v21  ;;  %2512 = vmatprep.subr.bf16.mxu0 %v2620_v24  ;;  %v2652_v21 = vld [vmem:[#allocation7 + $0x40] ss:$8 sps:$4 sm:$0xff]  }
  0x4a   :  { %2544 = vmatprep.subr.bf16.mxu1 %v2621_v25 }
  0x4b   :  { %2513 = vmatpush3.bf16.msra.mxu0 %v2620_v24  ;;  %v2663_v24 = vld [vmem:[#allocation7 + $0x134] ss:$8 sps:$4 sm:$0xff]  }
  0x4c   :  { %137 = vbcast.lane.b32.xlu1 %v131_v22, 264  ;;  %133 = vbcast.lane.b32.xlu0 %v131_v22, 256  ;;  %v2655_v22 = vld [vmem:[#allocation7 + $0x140] ss:$8 sps:$4 sm:$0xff]  }
  0x4d   :  { %2545 = vmatpush3.bf16.msra.mxu1 %v2621_v25  ;;  %2514 = vmatprep.subr.bf16.mxu0 %v2622_v28  ;;  %v2658_v25 = vld [vmem:[#allocation7 + $0x30] ss:$8 sps:$4 sm:$0xff]  }
  0x4e   :  { %2546 = vmatprep.subr.bf16.mxu1 %v2623_v29 }
  0x4f   :  { %2515 = vmatpush3.bf16.msra.mxu0 %v2622_v28  ;;  %v2669_v28 = vld [vmem:[#allocation7 + $0x124] ss:$8 sps:$4 sm:$0xff]  }
  0x50   :  { %148 = vbcast.lane.b32.xlu1 %v142_v26, 264  ;;  %144 = vbcast.lane.b32.xlu0 %v142_v26, 256  ;;  %v2661_v26 = vld [vmem:[#allocation7 + $0x130] ss:$8 sps:$4 sm:$0xff]  }
  0x51   :  { %2547 = vmatpush3.bf16.msra.mxu1 %v2623_v29  ;;  %2516 = vmatprep.subr.bf16.mxu0 %v2624_v32  ;;  %v2664_v29 = vld [vmem:[#allocation7 + $0x20] ss:$8 sps:$4 sm:$0xff]  }
  0x52   :  { %2548 = vmatprep.subr.bf16.mxu1 %v2625_v33 }
  0x53   :  { %2517 = vmatpush3.bf16.msra.mxu0 %v2624_v32  ;;  %v2675_v32 = vld [vmem:[#allocation7 + $0x114] ss:$8 sps:$4 sm:$0xff]  }
  0x54   :  { %159 = vbcast.lane.b32.xlu1 %v153_v30, 264  ;;  %155 = vbcast.lane.b32.xlu0 %v153_v30, 256  ;;  %v2667_v30 = vld [vmem:[#allocation7 + $0x120] ss:$8 sps:$4 sm:$0xff]  }
  0x55   :  { %2549 = vmatpush3.bf16.msra.mxu1 %v2625_v33  ;;  %2566 = vmatprep.subr.bf16.mxu0 %v2626_v35  ;;  %v2670_v33 = vld [vmem:[#allocation7 + $0x10] ss:$8 sps:$4 sm:$0xff]  }
  0x56   :  { %985 = vmatprep.subr.bf16.mxu1 %v2636_v7 }
  0x58   :  { %170 = vbcast.lane.b32.xlu1 %v164_v34, 264  ;;  %166 = vbcast.lane.b32.xlu0 %v164_v34, 256  ;;  %v2673_v34 = vld [vmem:[#allocation7 + $0x110] ss:$8 sps:$4 sm:$0xff]  }
  0xae   :  { %v101_v36 = vpop.permute.xlu1 %100  ;;  %v90_v37 = vpop.permute.xlu0 %89 }
  0xaf   :  { %vm174_vm0 = vcmp.eq.s32.totalorder %v2954_v38, %v101_v36  ;;  %vm172_vm3 = vcmp.eq.s32.totalorder %v2954_v38, %v90_v37  ;;  %v2681_v36 = vld [vmem:[#allocation7 + $0x104] ss:$8 sps:$4 sm:$0xff]   ;;  %v2676_v37 = vld [vmem:[#allocation7] ss:$8 sps:$4 sm:$0xff]  }
  0xb2   :  { %v105_v39 = vpop.permute.xlu1 %104  ;;  %v94_v40 = vpop.permute.xlu0 %93 }
  0xb3   :  { %vm175_vm1 = vcmp.eq.s32.totalorder %v2954_v38, %v105_v39  ;;  %vm173_vm2 = vcmp.eq.s32.totalorder %v2954_v38, %v94_v40  ;;  %v2871_v39 = vmov 0   ;;  %v2684_v40 = vld [vmem:[#allocation7 + $0xf4] ss:$8 sps:$4 sm:$0xff]  }
  0xb4   :  { %vm2960_vm4 = vmpackc.low %vm175_vm1, %vm174_vm0 }
  0xb5   :  { %vm2964_vm5 = vmpackc.low %vm173_vm2, %vm172_vm3 }
  0xb6   :  { %2518 = vmatprep.mubr.msk.bf16.mxu0 %vm2964_vm5, %v2870_v44  ;;  %2550 = vmatprep.mubr.msk.bf16.mxu1 %vm2964_vm5, %v2870_v44  ;;  %v116_v45 = vpop.permute.xlu1 %115  ;;  %v112_v46 = vpop.permute.xlu0 %111 }
  0xb7   :  { %2519 = vmatmul.mubr.msk.bf16.vlgmr.msra.gmra.mxu0 %vm2960_vm4, %v2870_v44  ;;  %2551 = vmatmul.mubr.msk.bf16.vlgmr.msra.gmra.mxu1 %vm2960_vm4, %v2870_v44  ;;  %vm177_vm6 = vcmp.eq.s32.totalorder %v2954_v38, %v116_v45  ;;  %vm176_vm7 = vcmp.eq.s32.totalorder %v2954_v38, %v112_v46 }
  0xb8   :  { %2567 = vmatpush3.bf16.msra.mxu0 %v2626_v35  ;;  %vm2982_vm8 = vmpackc.low %vm177_vm6, %vm176_vm7  ;;  %986 = vmatpush1.bf16.msra.mxu1 %v2634_v9  ;;  %v2678_v35 = vld [vmem:[#allocation7 + $0x4] ss:$8 sps:$4 sm:$0xff]  }
  0xb9   :  { %2568 = vmatprep.subr.bf16.mxu0 %v2627_v43  ;;  %2522 = vmatprep.mubr.msk.bf16.mxu0 %vm2982_vm8, %v2870_v44 }
  0xba   :  { %2554 = vmatprep.mubr.msk.bf16.mxu1 %vm2982_vm8, %v2870_v44  ;;  %v127_v49 = vpop.permute.xlu1 %126  ;;  %v123_v50 = vpop.permute.xlu0 %122  ;;  %987 = vmatprep.subr.bf16.mxu1 %v2642_v11 }
  0xbb   :  { %vm179_vm9 = vcmp.eq.s32.totalorder %v2954_v38, %v127_v49  ;;  %vm178_vm10 = vcmp.eq.s32.totalorder %v2954_v38, %v123_v50 }
  0xbc   :  { %2569 = vmatpush3.bf16.msra.mxu0 %v2627_v43  ;;  %vm2994_vm11 = vmpackc.low %vm179_vm9, %vm178_vm10  ;;  %988 = vmatpush1.bf16.msra.mxu1 %v2640_v13 }
  0xbd   :  { %2570 = vmatprep.subr.bf16.mxu0 %v2628_v48  ;;  %989 = vmatprep.subr.bf16.mxu1 %v2648_v15 }
  0xbe   :  { %v138_v53 = vpop.permute.xlu1 %137  ;;  %v134_v54 = vpop.permute.xlu0 %133 }
  0xbf   :  { %2523 = vmatmul.mubr.msk.bf16.gmra.mxu0 %vm2994_vm11, %v2870_v44  ;;  %2555 = vmatmul.mubr.msk.bf16.gmra.mxu1 %vm2994_vm11, %v2870_v44  ;;  %vm181_vm12 = vcmp.eq.s32.totalorder %v2954_v38, %v138_v53  ;;  %vm180_vm13 = vcmp.eq.s32.totalorder %v2954_v38, %v134_v54 }
  0xc0   :  { %2571 = vmatpush3.bf16.msra.mxu0 %v2628_v48  ;;  %vm3006_vm14 = vmpackc.low %vm181_vm12, %vm180_vm13  ;;  %990 = vmatpush1.bf16.msra.mxu1 %v2646_v17  ;;  %vm2038_vm12 = vcmask 1041409   ;;  %vm2040_vm13 = vcmask 1042434  }
  0xc1   :  { %2572 = vmatprep.subr.bf16.mxu0 %v2629_v52  ;;  %2526 = vmatprep.mubr.msk.bf16.mxu0 %vm3006_vm14, %v2870_v44 }
  0xc2   :  { %2558 = vmatprep.mubr.msk.bf16.mxu1 %vm3006_vm14, %v2870_v44  ;;  %v149_v57 = vpop.permute.xlu1 %148  ;;  %v145_v58 = vpop.permute.xlu0 %144  ;;  %991 = vmatprep.subr.bf16.mxu1 %v2654_v19 }
  0xc3   :  { %vm183_vm15 = vcmp.eq.s32.totalorder %v2954_v38, %v149_v57  ;;  %vm182_vm0 = vcmp.eq.s32.totalorder %v2954_v38, %v145_v58 }
  0xc4   :  { %2573 = vmatpush3.bf16.msra.mxu0 %v2629_v52  ;;  %vm3018_vm1 = vmpackc.low %vm183_vm15, %vm182_vm0  ;;  %992 = vmatpush1.bf16.msra.mxu1 %v2652_v21  ;;  %vm2044_vm15 = vcmask 1044484   ;;  %vm2046_vm0 = vcmask 1045509  }
  0xc5   :  { %2574 = vmatprep.subr.bf16.mxu0 %v2630_v56  ;;  %993 = vmatprep.subr.bf16.mxu1 %v2660_v23 }
  0xc6   :  { %v160_v61 = vpop.permute.xlu1 %159  ;;  %v156_v62 = vpop.permute.xlu0 %155 }
  0xc7   :  { %2527 = vmatmul.mubr.msk.bf16.gmra.mxu0 %vm3018_vm1, %v2870_v44  ;;  %2559 = vmatmul.mubr.msk.bf16.gmra.mxu1 %vm3018_vm1, %v2870_v44  ;;  %vm185_vm2 = vcmp.eq.s32.totalorder %v2954_v38, %v160_v61  ;;  %vm184_vm3 = vcmp.eq.s32.totalorder %v2954_v38, %v156_v62 }
  0xc8   :  { %2575 = vmatpush3.bf16.msra.mxu0 %v2630_v56  ;;  %vm3030_vm6 = vmpackc.low %vm185_vm2, %vm184_vm3  ;;  %994 = vmatpush1.bf16.msra.mxu1 %v2658_v25  ;;  %vm2050_vm2 = vcmask 1047559  }
  0xc9   :  { %2576 = vmatprep.subr.bf16.mxu0 %v2631_v60  ;;  %2530 = vmatprep.mubr.msk.bf16.mxu0 %vm3030_vm6, %v2870_v44 }
  0xca   :  { %2562 = vmatprep.mubr.msk.bf16.mxu1 %vm3030_vm6, %v2870_v44  ;;  %v171_v4 = vpop.permute.xlu1 %170  ;;  %v167_v5 = vpop.permute.xlu0 %166  ;;  %995 = vmatprep.subr.bf16.mxu1 %v2666_v27 }
  0xcb   :  { %vm187_vm7 = vcmp.eq.s32.totalorder %v2954_v38, %v171_v4  ;;  %vm186_vm9 = vcmp.eq.s32.totalorder %v2954_v38, %v167_v5  ;;  %v2679_v38 = vld [vmem:[#allocation7 + $0x100] ss:$8 sps:$4 sm:$0xff]   ;;  %v2872_v5 = vmov 0.0  }
  0xcc   :  { %2577 = vmatpush3.bf16.msra.mxu0 %v2631_v60  ;;  %vm2323_vm10 = vmpackc.low %vm187_vm7, %vm186_vm9  ;;  %996 = vmatpush1.bf16.msra.mxu1 %v2664_v29  ;;  %v230_v60 = vadd.s32 8, %v2927_v1 }
  0xcd   :  { %2578 = vmatprep.subr.bf16.mxu0 %v2632_v0  ;;  %997 = vmatprep.subr.bf16.mxu1 %v2672_v31 }
  0xcf   :  { %2531 = vmatmul.mubr.msk.bf16.gmra.mxu0 %vm2323_vm10, %v2870_v44  ;;  %2563 = vmatmul.mubr.msk.bf16.gmra.mxu1 %vm2323_vm10, %v2870_v44 }
  0xd0   :  { %2579 = vmatpush3.bf16.msra.mxu0 %v2632_v0  ;;  %2582 = vmatprep.mubr.msk.bf16.mxu0 %vm2964_vm5, %v2870_v44  ;;  %vm599_vm5 = vcmp.lt.s32.totalorder %v2927_v1, 1 }
  0xd1   :  { %2580 = vmatprep.subr.bf16.mxu0 %v2633_v6  ;;  %998 = vmatpush1.bf16.msra.mxu1 %v2670_v33 }
  0xd2   :  { %999 = vmatprep.subr.bf16.mxu1 %v2678_v35  ;;  %1017 = vmatprep.mubr.bf16.mxu1 %v2871_v39 }
  0xd4   :  { %2581 = vmatpush3.bf16.msra.mxu0 %v2633_v6 }
  0xd5   :  { %1212 = vmatprep.subr.bf16.mxu0 %v2639_v8  ;;  %1000 = vmatpush1.bf16.msra.mxu1 %v2676_v37  ;;  %v3147_v37 = vld [vmem:[%s3947_s2] ss:$0 sm:$0xff] }
  0xd6   :  { %1501 = vmatprep.subr.bf16.mxu1 %v2684_v40 }
  0xd7   :  { %2583 = vmatmul.mubr.msk.bf16.vlgmr.msra.gmra.mxu0 %vm2960_vm4, %v2870_v44  ;;  %vm231_vm4 = vcmp.ne.s32.totalorder %v2927_v1, 0 }
  0xd8   :  { %2586 = vmatprep.mubr.msk.bf16.mxu0 %vm2982_vm8, %v2870_v44  ;;  %1213 = vmatpush1.bf16.msra.mxu0 %v2637_v10  ;;  %v3108_v6 = vsel %vm231_vm4, 1.0, %v2872_v5  ;;  %vm238_vm8 = vcmp.ne.s32.totalorder %v230_v60, 15 }
  0xd9   :  { %1214 = vmatprep.subr.bf16.mxu0 %v2645_v12 }
  0xdc   :  { %1215 = vmatpush1.bf16.msra.mxu0 %v2643_v14 }
  0xdd   :  { %1216 = vmatprep.subr.bf16.mxu0 %v2651_v16 }
  0xdf   :  { %2587 = vmatmul.mubr.msk.bf16.gmra.mxu0 %vm2994_vm11, %v2870_v44  ;;  %vm793_vm11 = vcmp.lt.s32.totalorder %v2927_v1, 7 }
  0xe0   :  { %2590 = vmatprep.mubr.msk.bf16.mxu0 %vm3006_vm14, %v2870_v44  ;;  %1217 = vmatpush1.bf16.msra.mxu0 %v2649_v18  ;;  %vm2042_vm14 = vcmask 1043459  }
  0xe1   :  { %1218 = vmatprep.subr.bf16.mxu0 %v2657_v20  ;;  %v3122_v20 = vsel %vm238_vm8, 1.0, %v2872_v5 }
  0xe4   :  { %1219 = vmatpush1.bf16.msra.mxu0 %v2655_v22 }
  0xe5   :  { %1220 = vmatprep.subr.bf16.mxu0 %v2663_v24 }
  0xe7   :  { %2591 = vmatmul.mubr.msk.bf16.gmra.mxu0 %vm3018_vm1, %v2870_v44  ;;  %vm2048_vm1 = vcmask 1046534  }
  0xe8   :  { %2594 = vmatprep.mubr.msk.bf16.mxu0 %vm3030_vm6, %v2870_v44  ;;  %1221 = vmatpush1.bf16.msra.mxu0 %v2661_v26 }
  0xe9   :  { %1222 = vmatprep.subr.bf16.mxu0 %v2669_v28 }
  0xec   :  { %1223 = vmatpush1.bf16.msra.mxu0 %v2667_v30 }
  0xed   :  { %1224 = vmatprep.subr.bf16.mxu0 %v2675_v32 }
  0xef   :  { %2595 = vmatmul.mubr.msk.bf16.gmra.mxu0 %vm2323_vm10, %v2870_v44 }
  0xf0   :  { %1225 = vmatpush1.bf16.msra.mxu0 %v2673_v34  ;;  %1244 = vmatprep.mubr.bf16.mxu0 %v2871_v39 }
  0xf1   :  { %1226 = vmatprep.subr.bf16.mxu0 %v2681_v36 }
  0xf4   :  { %1227 = vmatpush1.bf16.msra.mxu0 %v2679_v38 }
 0x177   :  { %v2520_v41 = vpop.f32.mrf.mxu0  ;;  %v3074_v47 = vpop.f32.mrf.mxu1 }
 0x178   :  { %v585_v12 = vrot.slane %v2520_v41, 7  ;;  %v779_v13 = vrot.slane %v3074_v47, 1 }
 0x179   :  { %v341_v42 = vpop.f32.mrf.mxu0  ;;  %v3080_v50 = vpop.f32.mrf.mxu1 }
 0x17a   :  { %v583_v62 = vrot.slane %v341_v42, 7  ;;  %v777_v14 = vrot.slane %v3080_v50, 1 }
 0x17b   :  { %v3068_v43 = vpop.f32.mrf.mxu0  ;;  %v3086_v53 = vpop.f32.mrf.mxu1 }
 0x17c   :  { %v586_v15 = vrot.slane %v3068_v43, 7  ;;  %v780_v21 = vrot.slane %v3086_v53, 1 }
 0x17d   :  { %v344_v44 = vpop.f32.mrf.mxu0  ;;  %v523_v56 = vpop.f32.mrf.mxu1 }
 0x17e   :  { %v584_v8 = vrot.slane %v344_v44, 7  ;;  %v778_v9 = vrot.slane %v523_v56, 1  ;;  %v612_v28 = vsel %vm599_vm5, %v585_v12, %v586_v15  ;;  %v806_v5 = vsel %vm793_vm11, %v779_v13, %v780_v21 }
 0x17f   :  { %v3070_v45 = vpop.f32.mrf.mxu0  ;;  %v3096_v59 = vpop.f32.mrf.mxu1 }
 0x180   :  { %v807_v22 = vsel %vm793_vm11, %v778_v9, %v779_v13  ;;  %v613_v23 = vsel %vm599_vm5, %v584_v8, %v585_v12  ;;  %v808_v24 = vsel %vm793_vm11, %v777_v14, %v778_v9  ;;  %v614_v29 = vsel %vm599_vm5, %v583_v62, %v584_v8 }
 0x181   :  { %v3072_v46 = vpop.f32.mrf.mxu0  ;;  %v3106_v4 = vpop.f32.mrf.mxu1  ;;  %v618_v32 = vmul.f32 %v3108_v6, %v613_v23  ;;  %v811_v35 = vmul.f32 %v3122_v20, %v807_v22 }
 0x182   :  { %v781_v16 = vrot.slane %v3106_v4, 1  ;;  %v587_v36 = vrot.slane %v3072_v46, 7 }
 0x183   :  { %v3076_v48 = vpop.f32.mrf.mxu0  ;;  %v3120_v18 = vpop.f32.mrf.mxu1 }
 0x184   :  { %v805_v27 = vsel %vm793_vm11, %v780_v21, %v781_v16  ;;  %v2687_v21 = vld [vmem:[#allocation7 + $0xe4] ss:$8 sps:$4 sm:$0xff]  }
 0x185   :  { %v3078_v49 = vpop.f32.mrf.mxu0  ;;  %v539_v31 = vpop.f32.mrf.mxu1  ;;  %v813_v42 = vmul.f32 %v3122_v20, %v805_v27 }
 0x186   :  { %v782_v44 = vrot.slane %v539_v31, 1  ;;  %v588_v53 = vrot.slane %v3078_v49, 7 }
 0x187   :  { %v3082_v51 = vpop.f32.mrf.mxu0  ;;  %v3154_v56 = vpop.f32.mrf.mxu1 }
 0x189   :  { %v3084_v52 = vpop.f32.mrf.mxu0 }
 0x18b   :  { %v3088_v54 = vpop.f32.mrf.mxu0 }
 0x18d   :  { %v3090_v55 = vpop.f32.mrf.mxu0 }
 0x18f   :  { %v3092_v57 = vpop.f32.mrf.mxu0 }
 0x191   :  { %v3094_v58 = vpop.f32.mrf.mxu0 }
 0x193   :  { %v3100_v61 = vpop.f32.mrf.mxu0 }
 0x194   :  { %v598_v63 = vrot.slane %v3100_v61, 7 }
 0x195   :  { %v3104_v0 = vpop.f32.mrf.mxu0 }
 0x196   :  { %v615_v7 = vsel %vm599_vm5, %v598_v63, %v583_v62  ;;  %v783_v62 = vrot.slane %v3096_v59, 1 }
 0x197   :  { %v2584_v10 = vpop.f32.mrf.mxu0  ;;  %v616_v11 = vmul.f32 %v3108_v6, %v615_v7  ;;  %v611_v7 = vsel %vm599_vm5, %v586_v15, %v587_v36  ;;  %v610_v15 = vsel %vm599_vm5, %v587_v36, %v588_v53  ;;  %v2690_v36 = vld [vmem:[#allocation7 + $0xd4] ss:$8 sps:$4 sm:$0xff]  }
 0x198   :  { %v723_v40 = vadd.f32 %v2584_v10, %v618_v32  ;;  %v803_v49 = vsel %vm793_vm11, %v782_v44, %v783_v62  ;;  %v620_v13 = vmul.f32 %v3108_v6, %v611_v7  ;;  %v2685_v32 = vld [vmem:[#allocation7 + $0xe0] ss:$8 sps:$4 sm:$0xff]  }
 0x199   :  { %v714_v17 = vpop.f32.mrf.mxu0 }
 0x19a   :  { %v715_v19 = vadd.f32 %v714_v17, %v616_v11  ;;  %v828_v9 = vadd.f32 %v806_v5, %v723_v40  ;;  %v2682_v17 = vld [vmem:[#allocation7 + $0xf0] ss:$8 sps:$4 sm:$0xff]   ;;  %v784_v40 = vrot.slane %v3120_v18, 1  ;;  %v591_v5 = vrot.slane %v3084_v52, 7 }
 0x19b   :  { %v2585_v25 = vpop.f32.mrf.mxu0 }
 0x19c   :  { %v826_v26 = vadd.f32 %v808_v24, %v715_v19  ;;  %v726_v33 = vadd.f32 %v2585_v25, %v612_v28  ;;  %v3166_v19 = vpop.f32.mrf.mxu1  ;;  %v815_v28 = vmul.f32 %v3122_v20, %v803_v49 }
 0x19d   :  { %v717_v30 = vpop.f32.mrf.mxu0  ;;  %v785_v31 = vrot.slane %v3166_v19, 1 }
 0x19e   :  { %v718_v34 = vadd.f32 %v717_v30, %v614_v29  ;;  %v849_v41 = vadd.f32 %v3147_v37, %v826_v26  ;;  %v829_v46 = vadd.f32 %v813_v42, %v726_v33  ;;  %v851_v26 = vadd.f32 %v3147_v37, %v828_v9  ;;  %v3184_v33 = vpop.f32.mrf.mxu1  ;;  %v2693_v9 = vld [vmem:[#allocation7 + $0xc4] ss:$8 sps:$4 sm:$0xff]  }
 0x19f   :  { %v3149_v38 = vpop.f32.mrf.mxu0  ;;  %v589_v29 = vrot.slane %v3070_v45, 7  ;;  %v590_v30 = vrot.slane %v3076_v48, 7  ;;  %v804_v48 = vsel %vm793_vm11, %v781_v16, %v782_v44  ;;  %v2688_v44 = vld [vmem:[#allocation7 + $0xd0] ss:$8 sps:$4 sm:$0xff]  }
 0x1a0   :  { %v827_v43 = vadd.f32 %v811_v35, %v718_v34  ;;  %v865_v10 = vmax.f32 %v849_v41, 0.0  ;;  %v852_v22 = vadd.f32 %v3147_v37, %v829_v46  ;;  %v867_v42 = vmax.f32 %v851_v26, 0.0  ;;  %v3200_v18 = vpop.f32.mrf.mxu1 }
 0x1a1   :  { %v730_v47 = vpop.f32.mrf.mxu0  ;;  %v609_v45 = vsel %vm599_vm5, %v588_v53, %v589_v29  ;;  %v608_v46 = vsel %vm599_vm5, %v589_v29, %v590_v30 }
 0x1a2   :  { %v850_v60 = vadd.f32 %v3147_v37, %v827_v43  ;;  %v731_v27 = vadd.f32 %v730_v47, %v620_v13  ;;  %v868_v34 = vmax.f32 %v852_v22, 0.0  ;;  %v801_v47 = vsel %vm793_vm11, %v784_v40, %v785_v31  ;;  %v3218_v52 = vpop.f32.mrf.mxu1  ;;  %v2691_v22 = vld [vmem:[#allocation7 + $0xc0] ss:$8 sps:$4 sm:$0xff]  }
 0x1a3   :  { %v2589_v8 = vpop.f32.mrf.mxu0  ;;  %v622_v53 = vmul.f32 %v3108_v6, %v609_v45  ;;  %v817_v49 = vmul.f32 %v3122_v20, %v801_v47  ;;  %v787_v13 = vrot.slane %v3154_v56, 1  ;;  %v594_v47 = vrot.slane %v3088_v54, 7 }
 0x1a4   :  { %v866_v11 = vmax.f32 %v850_v60, 0.0  ;;  %v830_v43 = vadd.f32 %v804_v48, %v731_v27  ;;  %v742_v4 = vadd.f32 %v2589_v8, %v608_v46  ;;  %v3204_v16 = vpack.c.bf16 %v868_v34, %v867_v42  ;;  %v3233_v59 = vpop.f32.mrf.mxu1 }
 0x1a5   :  { %v733_v12 = vpop.f32.mrf.mxu0  ;;  %v592_v8 = vrot.slane %v3090_v55, 7  ;;  %v607_v55 = vsel %vm599_vm5, %v590_v30, %v591_v5  ;;  %v789_v46 = vrot.slane %v3233_v59, 1 }
 0x1a6   :  { %v3169_v23 = vpack.c.bf16 %v866_v11, %v865_v10  ;;  %v734_v24 = vadd.f32 %v733_v12, %v610_v15  ;;  %v739_v10 = vadd.f32 %v3149_v38, %v622_v53  ;;  %v853_v11 = vadd.f32 %v3147_v37, %v830_v43 }
 0x1a7   :  { %v3174_v25 = vpop.f32.mrf.mxu0  ;;  %v786_v12 = vrot.slane %v3200_v18, 1  ;;  %v802_v15 = vsel %vm793_vm11, %v783_v62, %v784_v40  ;;  %v606_v29 = vsel %vm599_vm5, %v591_v5, %v592_v8  ;;  %v2699_v40 = vld [vmem:[#allocation7 + $0xa4] ss:$8 sps:$4 sm:$0xff]   ;;  %v593_v43 = vrot.slane %v3082_v51, 7  ;;  %v3250_v18 = vpop.f32.mrf.mxu1  ;;  %v2702_v5 = vld [vmem:[#allocation7 + $0x94] ss:$8 sps:$4 sm:$0xff]  }
 0x1a8   :  { %1018 = vmatmul.mubr.bf16.vlgmr.msra.gmra.mxu1 %v3169_v23  ;;  %1245 = vmatmul.mubr.bf16.vlgmr.msra.gmra.mxu0 %v3169_v23  ;;  %v831_v35 = vadd.f32 %v815_v28, %v734_v24  ;;  %v2696_v24 = vld [vmem:[#allocation7 + $0xb4] ss:$8 sps:$4 sm:$0xff]   ;;  %v832_v26 = vadd.f32 %v802_v15, %v739_v10  ;;  %v869_v27 = vmax.f32 %v853_v11, 0.0  ;;  %v2705_v15 = vld [vmem:[#allocation7 + $0x84] ss:$8 sps:$4 sm:$0xff]  }
 0x1a9   :  { %1502 = vmatpush1.bf16.msra.mxu1 %v2682_v17  ;;  %1027 = vmatprep.mubr.bf16.mxu1 %v2871_v39  ;;  %v746_v41 = vpop.f32.mrf.mxu0  ;;  %v833_v17 = vadd.f32 %v817_v49, %v742_v4  ;;  %v799_v28 = vsel %vm793_vm11, %v786_v12, %v787_v13  ;;  %v2697_v4 = vld [vmem:[#allocation7 + $0xa0] ss:$8 sps:$4 sm:$0xff]   ;;  %v800_v51 = vsel %vm793_vm11, %v785_v31, %v786_v12  ;;  %v571_v49 = vpop.f32.mrf.mxu1 }
 0x1aa   :  { %1254 = vmatprep.mubr.bf16.mxu0 %v2871_v39  ;;  %1503 = vmatprep.subr.bf16.mxu1 %v2687_v21  ;;  %v854_v60 = vadd.f32 %v3147_v37, %v831_v35  ;;  %v2694_v35 = vld [vmem:[#allocation7 + $0xb0] ss:$8 sps:$4 sm:$0xff]   ;;  %v855_v45 = vadd.f32 %v3147_v37, %v832_v26  ;;  %v819_v42 = vmul.f32 %v3122_v20, %v799_v28  ;;  %v790_v26 = vrot.slane %v571_v49, 1  ;;  %v2703_v28 = vld [vmem:[#allocation7 + $0x80] ss:$8 sps:$4 sm:$0xff]  }
 0x1ab   :  { %v3207_v7 = vpop.f32.mrf.mxu0  ;;  %v856_v62 = vadd.f32 %v3147_v37, %v833_v17  ;;  %v2700_v17 = vld [vmem:[#allocation7 + $0x90] ss:$8 sps:$4 sm:$0xff]  }
 0x1ac   :  { %v870_v38 = vmax.f32 %v854_v60, 0.0  ;;  %v788_v60 = vrot.slane %v3184_v33, 1  ;;  %v604_v33 = vsel %vm599_vm5, %v593_v43, %v594_v47 }
 0x1ad   :  { %1504 = vmatpush1.bf16.msra.mxu1 %v2685_v32  ;;  %v749_v21 = vpop.f32.mrf.mxu0  ;;  %v624_v32 = vmul.f32 %v3108_v6, %v607_v55  ;;  %v872_v53 = vmax.f32 %v856_v62, 0.0  ;;  %v758_v19 = vadd.f32 %v3207_v7, %v604_v33  ;;  %v596_v7 = vrot.slane %v3104_v0, 7 }
 0x1ae   :  { %1505 = vmatprep.subr.bf16.mxu1 %v2690_v36  ;;  %v750_v30 = vadd.f32 %v749_v21, %v606_v29  ;;  %v3237_v34 = vpack.c.bf16 %v870_v38, %v869_v27  ;;  %v797_v11 = vsel %vm793_vm11, %v788_v60, %v789_v46  ;;  %v595_v38 = vrot.slane %v3094_v58, 7 }
 0x1af   :  { %v3239_v36 = vpop.f32.mrf.mxu0  ;;  %v747_v48 = vadd.f32 %v746_v41, %v624_v32  ;;  %v798_v29 = vsel %vm793_vm11, %v787_v13, %v788_v60 }
 0x1b0   :  { %1028 = vmatmul.mubr.bf16.gmra.mxu1 %v3204_v16  ;;  %1255 = vmatmul.mubr.bf16.gmra.mxu0 %v3204_v16  ;;  %v835_v41 = vadd.f32 %v819_v42, %v750_v30  ;;  %v603_v62 = vsel %vm599_vm5, %v594_v47, %v595_v38  ;;  %v597_v47 = vrot.slane %v3092_v57, 7 }
 0x1b1   :  { %1037 = vmatprep.mubr.bf16.mxu1 %v2871_v39  ;;  %1264 = vmatprep.mubr.bf16.mxu0 %v2871_v39  ;;  %v762_v54 = vpop.f32.mrf.mxu0  ;;  %v834_v10 = vadd.f32 %v800_v51, %v747_v48  ;;  %v628_v56 = vmul.f32 %v3108_v6, %v603_v62 }
 0x1b2   :  { %1506 = vmatpush1.bf16.msra.mxu1 %v2688_v44  ;;  %v605_v44 = vsel %vm599_vm5, %v592_v8, %v593_v43  ;;  %v858_v31 = vadd.f32 %v3147_v37, %v835_v41  ;;  %v601_v60 = vsel %vm599_vm5, %v596_v7, %v597_v47 }
 0x1b3   :  { %1507 = vmatprep.subr.bf16.mxu1 %v2693_v9  ;;  %v871_v9 = vmax.f32 %v855_v45, 0.0  ;;  %v626_v8 = vmul.f32 %v3108_v6, %v605_v44  ;;  %v857_v21 = vadd.f32 %v3147_v37, %v834_v10  ;;  %v763_v42 = vadd.f32 %v762_v54, %v628_v56 }
 0x1b4   :  { %v874_v27 = vmax.f32 %v858_v31, 0.0  ;;  %v796_v44 = vsel %vm793_vm11, %v789_v46, %v790_v26 }
 0x1b5   :  { %v3268_v12 = vpack.c.bf16 %v872_v53, %v871_v9  ;;  %v755_v55 = vadd.f32 %v3174_v25, %v626_v8  ;;  %v791_v25 = vrot.slane %v3218_v52, 1  ;;  %v873_v30 = vmax.f32 %v857_v21, 0.0  ;;  %v2720_v21 = vld [vmem:[#allocation8 + $0x34] ss:$8 sps:$4 sm:$0xff]  }
 0x1b6   :  { %1508 = vmatpush1.bf16.msra.mxu1 %v2691_v22  ;;  %v2597_v22 = vpop.f32.mrf.mxu0  ;;  %v792_v53 = vrot.slane %v3250_v18, 1  ;;  %v838_v54 = vadd.f32 %v796_v44, %v763_v42  ;;  %v600_v18 = vsel %vm599_vm5, %v597_v47, %v598_v63 }
 0x1b7   :  { %1509 = vmatprep.subr.bf16.mxu1 %v2696_v24  ;;  %v821_v24 = vmul.f32 %v3122_v20, %v797_v11  ;;  %v836_v32 = vadd.f32 %v798_v29, %v755_v55  ;;  %v885_v48 = vpack.c.bf16 %v874_v27, %v873_v30  ;;  %v774_v9 = vadd.f32 %v2597_v22, %v600_v18  ;;  %v2712_v22 = vld [vmem:[#allocation8 + $0x50] ss:$8 sps:$4 sm:$0xff]   ;;  %v2715_v55 = vld [vmem:[#allocation8 + $0x40] ss:$8 sps:$4 sm:$0xff]  }
 0x1b8   :  { %1038 = vmatmul.mubr.bf16.gmra.mxu1 %v3237_v34  ;;  %1265 = vmatmul.mubr.bf16.gmra.mxu0 %v3237_v34  ;;  %v765_v0 = vpop.f32.mrf.mxu0  ;;  %v809_v57 = vsel %vm793_vm11, %v792_v53, %v777_v14  ;;  %v861_v11 = vadd.f32 %v3147_v37, %v838_v54  ;;  %v794_v14 = vsel %vm793_vm11, %v791_v25, %v792_v53  ;;  %v2727_v29 = vld [vmem:[#allocation8] ss:$8 sps:$4 sm:$0xff]  }
 0x1b9   :  { %1047 = vmatprep.mubr.bf16.mxu1 %v2871_v39  ;;  %1274 = vmatprep.mubr.bf16.mxu0 %v2871_v39  ;;  %v837_v58 = vadd.f32 %v821_v24, %v758_v19  ;;  %v859_v13 = vadd.f32 %v3147_v37, %v836_v32  ;;  %v825_v50 = vmul.f32 %v3122_v20, %v809_v57  ;;  %v2718_v24 = vld [vmem:[#allocation8 + $0x30] ss:$8 sps:$4 sm:$0xff]   ;;  %v2733_v54 = vld [vmem:[#allocation8 + $0xe0] ss:$8 sps:$4 sm:$0xff]  }
 0x1ba   :  { %1510 = vmatpush1.bf16.msra.mxu1 %v2694_v35  ;;  %v795_v35 = vsel %vm793_vm11, %v790_v26, %v791_v25  ;;  %v877_v49 = vmax.f32 %v861_v11, 0.0  ;;  %v2726_v26 = vld [vmem:[#allocation8 + $0x14] ss:$8 sps:$4 sm:$0xff]   ;;  %v2729_v25 = vld [vmem:[#allocation8 + $0x4] ss:$8 sps:$4 sm:$0xff]  }
 0x1bb   :  { %1511 = vmatprep.subr.bf16.mxu1 %v2699_v40  ;;  %v602_v40 = vsel %vm599_vm5, %v595_v38, %v596_v7  ;;  %v860_v52 = vadd.f32 %v3147_v37, %v837_v58  ;;  %v823_v43 = vmul.f32 %v3122_v20, %v795_v35  ;;  %v875_v51 = vmax.f32 %v859_v13, 0.0  ;;  %v2721_v7 = vld [vmem:[#allocation8 + $0x20] ss:$8 sps:$4 sm:$0xff]   ;;  %v2724_v58 = vld [vmem:[#allocation8 + $0x10] ss:$8 sps:$4 sm:$0xff]  }
 0x1bc   :  { %v766_v45 = vadd.f32 %v765_v0, %v602_v40  ;;  %v841_v61 = vadd.f32 %v825_v50, %v774_v9 }
 0x1bd   :  { %v876_v41 = vmax.f32 %v860_v52, 0.0  ;;  %v2732_v52 = vld [vmem:[#allocation8 + $0xf4] ss:$8 sps:$4 sm:$0xff]  }
 0x1be   :  { %1512 = vmatpush1.bf16.msra.mxu1 %v2697_v4  ;;  %v839_v4 = vadd.f32 %v823_v43, %v766_v45  ;;  %v864_v8 = vadd.f32 %v3147_v37, %v841_v61  ;;  %v2736_v61 = vld [vmem:[#allocation8 + $0xd0] ss:$8 sps:$4 sm:$0xff]  }
 0x1bf   :  { %1513 = vmatprep.subr.bf16.mxu1 %v2702_v5  ;;  %v630_v5 = vmul.f32 %v3108_v6, %v601_v60  ;;  %v886_v10 = vpack.c.bf16 %v876_v41, %v875_v51  ;;  %v2735_v60 = vld [vmem:[#allocation8 + $0xe4] ss:$8 sps:$4 sm:$0xff]  }
 0x1c0   :  { %1048 = vmatmul.mubr.bf16.gmra.mxu1 %v3268_v12  ;;  %1275 = vmatmul.mubr.bf16.gmra.mxu0 %v3268_v12  ;;  %v862_v59 = vadd.f32 %v3147_v37, %v839_v4  ;;  %v880_v31 = vmax.f32 %v864_v8, 0.0 }
 0x1c1   :  { %1057 = vmatprep.mubr.bf16.mxu1 %v2871_v39  ;;  %1284 = vmatprep.mubr.bf16.mxu0 %v2871_v39  ;;  %v771_v46 = vadd.f32 %v3239_v36, %v630_v5 }
 0x1c2   :  { %1514 = vmatpush1.bf16.msra.mxu1 %v2700_v17  ;;  %v878_v63 = vmax.f32 %v862_v59, 0.0 }
 0x1c3   :  { %1515 = vmatprep.subr.bf16.mxu1 %v2705_v15  ;;  %v840_v33 = vadd.f32 %v794_v14, %v771_v46  ;;  %v2717_v15 = vld [vmem:[#allocation8 + $0x44] ss:$8 sps:$4 sm:$0xff]   ;;  %v2738_v46 = vld [vmem:[#allocation8 + $0xd4] ss:$8 sps:$4 sm:$0xff]  }
 0x1c4   :  { %v887_v36 = vpack.c.bf16 %v878_v63, %v877_v49 }
 0x1c5   :  { %v863_v19 = vadd.f32 %v3147_v37, %v840_v33  ;;  %v2708_v37 = vld [vmem:[#allocation8 + $0x74] ss:$8 sps:$4 sm:$0xff]  }
 0x1c6   :  { %1516 = vmatpush1.bf16.msra.mxu1 %v2703_v28  ;;  %2223 = vmatprep.subr.bf16.mxu0 %v2708_v37 }
 0x1c7   :  { %v879_v17 = vmax.f32 %v863_v19, 0.0  ;;  %v2741_v19 = vld [vmem:[#allocation8 + $0xc4] ss:$8 sps:$4 sm:$0xff]  }
 0x1c8   :  { %1058 = vmatmul.mubr.bf16.gmra.mxu1 %v885_v48  ;;  %1285 = vmatmul.mubr.bf16.gmra.mxu0 %v885_v48 }
 0x1c9   :  { %1067 = vmatprep.mubr.bf16.mxu1 %v2871_v39  ;;  %1294 = vmatprep.mubr.bf16.mxu0 %v2871_v39  ;;  %v888_v38 = vpack.c.bf16 %v880_v31, %v879_v17 }
 0x1d0   :  { %1068 = vmatmul.mubr.bf16.gmra.mxu1 %v886_v10  ;;  %1295 = vmatmul.mubr.bf16.gmra.mxu0 %v886_v10 }
 0x1d1   :  { %1077 = vmatprep.mubr.bf16.mxu1 %v2871_v39  ;;  %1304 = vmatprep.mubr.bf16.mxu0 %v2871_v39 }
 0x1d8   :  { %1078 = vmatmul.mubr.bf16.gmra.mxu1 %v887_v36  ;;  %1305 = vmatmul.mubr.bf16.gmra.mxu0 %v887_v36 }
 0x1d9   :  { %1087 = vmatprep.mubr.bf16.mxu1 %v2871_v39  ;;  %1314 = vmatprep.mubr.bf16.mxu0 %v2871_v39 }
 0x1e0   :  { %1088 = vmatmul.mubr.bf16.gmra.mxu1 %v888_v38  ;;  %1315 = vmatmul.mubr.bf16.gmra.mxu0 %v888_v38 }
 0x1e1   :  { %1533 = vmatprep.mubr.bf16.mxu1 %v2871_v39 }
 0x1e8   :  { %1534 = vmatmul.mubr.bf16.vlgmr.msra.gmra.mxu1 %v3169_v23  ;;  %v2706_v23 = vld [vmem:[#allocation8 + $0x70] ss:$8 sps:$4 sm:$0xff]  }
 0x1e9   :  { %1543 = vmatprep.mubr.bf16.mxu1 %v2871_v39  ;;  %2224 = vmatpush1.bf16.msra.mxu0 %v2706_v23 }
 0x1f0   :  { %1544 = vmatmul.mubr.bf16.gmra.mxu1 %v3204_v16  ;;  %v2711_v16 = vld [vmem:[#allocation8 + $0x64] ss:$8 sps:$4 sm:$0xff]  }
 0x1f1   :  { %1553 = vmatprep.mubr.bf16.mxu1 %v2871_v39  ;;  %2225 = vmatprep.subr.bf16.mxu0 %v2711_v16 }
 0x1f8   :  { %1554 = vmatmul.mubr.bf16.gmra.mxu1 %v3237_v34  ;;  %v2709_v34 = vld [vmem:[#allocation8 + $0x60] ss:$8 sps:$4 sm:$0xff]  }
 0x1f9   :  { %1563 = vmatprep.mubr.bf16.mxu1 %v2871_v39  ;;  %2226 = vmatpush1.bf16.msra.mxu0 %v2709_v34 }
 0x200   :  { %1564 = vmatmul.mubr.bf16.gmra.mxu1 %v3268_v12  ;;  %v2714_v12 = vld [vmem:[#allocation8 + $0x54] ss:$8 sps:$4 sm:$0xff]  }
 0x201   :  { %1573 = vmatprep.mubr.bf16.mxu1 %v2871_v39  ;;  %2227 = vmatprep.subr.bf16.mxu0 %v2714_v12 }
 0x202   :  { %2228 = vmatpush1.bf16.msra.mxu0 %v2712_v22 }
 0x203   :  { %2229 = vmatprep.subr.bf16.mxu0 %v2717_v15  ;;  %v2744_v15 = vld [vmem:[#allocation8 + $0xb4] ss:$8 sps:$4 sm:$0xff]  }
 0x206   :  { %2230 = vmatpush1.bf16.msra.mxu0 %v2715_v55 }
 0x207   :  { %2231 = vmatprep.subr.bf16.mxu0 %v2720_v21 }
 0x208   :  { %1574 = vmatmul.mubr.bf16.gmra.mxu1 %v885_v48  ;;  %v2730_v48 = vld [vmem:[#allocation8 + $0xf0] ss:$8 sps:$4 sm:$0xff]  }
 0x209   :  { %1583 = vmatprep.mubr.bf16.mxu1 %v2871_v39 }
 0x20a   :  { %2232 = vmatpush1.bf16.msra.mxu0 %v2718_v24  ;;  %v2742_v24 = vld [vmem:[#allocation8 + $0xb0] ss:$8 sps:$4 sm:$0xff]  }
 0x210   :  { %1584 = vmatmul.mubr.bf16.gmra.mxu1 %v886_v10 }
 0x211   :  { %1593 = vmatprep.mubr.bf16.mxu1 %v2871_v39 }
 0x218   :  { %1594 = vmatmul.mubr.bf16.gmra.mxu1 %v887_v36 }
 0x219   :  { %1603 = vmatprep.mubr.bf16.mxu1 %v2871_v39  ;;  %v2723_v39 = vld [vmem:[#allocation8 + $0x24] ss:$8 sps:$4 sm:$0xff]  }
 0x21a   :  { %2233 = vmatprep.subr.bf16.mxu0 %v2723_v39 }
 0x21b   :  { %2234 = vmatpush1.bf16.msra.mxu0 %v2721_v7 }
 0x21c   :  { %2235 = vmatprep.subr.bf16.mxu0 %v2726_v26 }
 0x21f   :  { %2236 = vmatpush1.bf16.msra.mxu0 %v2724_v58 }
 0x220   :  { %1604 = vmatmul.mubr.bf16.gmra.mxu1 %v888_v38  ;;  %2237 = vmatprep.subr.bf16.mxu0 %v2729_v25  ;;  %v2739_v38 = vld [vmem:[#allocation8 + $0xc0] ss:$8 sps:$4 sm:$0xff]  }
 0x223   :  { %2238 = vmatpush1.bf16.msra.mxu0 %v2727_v29 }
 0x224   :  { %2239 = vmatprep.subr.bf16.mxu0 %v2732_v52 }
 0x227   :  { %2240 = vmatpush2.bf16.msra.mxu0 %v2730_v48 }
 0x228   :  { %2241 = vmatprep.subr.bf16.mxu0 %v2735_v60 }
 0x22b   :  { %2242 = vmatpush2.bf16.msra.mxu0 %v2733_v54 }
 0x22c   :  { %2243 = vmatprep.subr.bf16.mxu0 %v2738_v46 }
 0x22f   :  { %2244 = vmatpush2.bf16.msra.mxu0 %v2736_v61 }
 0x230   :  { %2245 = vmatprep.subr.bf16.mxu0 %v2741_v19 }
 0x233   :  { %2246 = vmatpush2.bf16.msra.mxu0 %v2739_v38 }
 0x234   :  { %2247 = vmatprep.subr.bf16.mxu0 %v2744_v15 }
 0x237   :  { %2248 = vmatpush2.bf16.msra.mxu0 %v2742_v24 }
 0x268   :  { %v3337_v27 = vpop.f32.mrf.mxu1  ;;  %v3339_v28 = vpop.f32.mrf.mxu0 }
 0x269   :  { %v3954_v35 = vrot.slane %v3337_v27, 7 }
 0x26a   :  { %v3341_v62 = vpop.f32.mrf.mxu1  ;;  %v3343_v0 = vpop.f32.mrf.mxu0 }
 0x26b   :  { %v3953_v13 = vrot.slane %v3341_v62, 7 }
 0x26c   :  { %v1023_v32 = vpop.f32.mrf.mxu1  ;;  %v3345_v30 = vpop.f32.mrf.mxu0 }
 0x26d   :  { %v1327_v40 = vrot.slane %v1023_v32, 7  ;;  %v2747_v32 = vld [vmem:[#allocation8 + $0xa4] ss:$8 sps:$4 sm:$0xff]  }
 0x26e   :  { %v1025_v56 = vpop.f32.mrf.mxu1  ;;  %v3348_v45 = vpop.f32.mrf.mxu0  ;;  %2249 = vmatprep.subr.bf16.mxu0 %v2747_v32 }
 0x26f   :  { %v1328_v42 = vrot.slane %v1025_v56, 7  ;;  %v3355_v43 = vsel %vm599_vm5, %v3954_v35, %v1327_v40  ;;  %v2745_v56 = vld [vmem:[#allocation8 + $0xa0] ss:$8 sps:$4 sm:$0xff]  }
 0x270   :  { %v1029_v47 = vpop.f32.mrf.mxu1  ;;  %v3357_v53 = vpop.f32.mrf.mxu0  ;;  %2250 = vmatpush2.bf16.msra.mxu0 %v2745_v56 }
 0x271   :  { %v1329_v41 = vrot.slane %v1029_v47, 7  ;;  %v3363_v4 = vsel %vm599_vm5, %v3953_v13, %v1328_v42  ;;  %v2750_v47 = vld [vmem:[#allocation8 + $0x94] ss:$8 sps:$4 sm:$0xff]  }
 0x272   :  { %v1031_v44 = vpop.f32.mrf.mxu1  ;;  %v3365_v51 = vpop.f32.mrf.mxu0  ;;  %2251 = vmatprep.subr.bf16.mxu0 %v2750_v47 }
 0x273   :  { %v1330_v57 = vrot.slane %v1031_v44, 7  ;;  %v3369_v18 = vsel %vm599_vm5, %v1327_v40, %v1329_v41  ;;  %v2748_v44 = vld [vmem:[#allocation8 + $0x90] ss:$8 sps:$4 sm:$0xff]  }
 0x274   :  { %v1033_v5 = vpop.f32.mrf.mxu1  ;;  %v3371_v9 = vpop.f32.mrf.mxu0  ;;  %2252 = vmatpush2.bf16.msra.mxu0 %v2748_v44  ;;  %v1618_v44 = vrot.slane %v3357_v53, 1  ;;  %v1617_v53 = vrot.slane %v3348_v45, 1 }
 0x275   :  { %v1331_v59 = vrot.slane %v1033_v5, 7  ;;  %v3375_v10 = vsel %vm599_vm5, %v1328_v42, %v1330_v57  ;;  %v2753_v5 = vld [vmem:[#allocation8 + $0x84] ss:$8 sps:$4 sm:$0xff]  }
 0x276   :  { %v1035_v11 = vpop.f32.mrf.mxu1  ;;  %v3377_v50 = vpop.f32.mrf.mxu0  ;;  %2253 = vmatprep.subr.bf16.mxu0 %v2753_v5 }
 0x277   :  { %v1332_v63 = vrot.slane %v1035_v11, 7  ;;  %v3381_v14 = vsel %vm599_vm5, %v1329_v41, %v1331_v59 }
 0x278   :  { %v1039_v33 = vpop.f32.mrf.mxu1  ;;  %v3383_v49 = vpop.f32.mrf.mxu0 }
 0x279   :  { %v1333_v8 = vrot.slane %v1039_v33, 7  ;;  %v3387_v36 = vsel %vm599_vm5, %v1330_v57, %v1332_v63  ;;  %v1622_v45 = vrot.slane %v3383_v49, 1 }
 0x27a   :  { %v1041_v31 = vpop.f32.mrf.mxu1  ;;  %v3389_v17 = vpop.f32.mrf.mxu0 }
 0x27b   :  { %v1334_v37 = vrot.slane %v1041_v31, 7  ;;  %v3393_v23 = vsel %vm599_vm5, %v1331_v59, %v1333_v8 }
 0x27c   :  { %v1043_v16 = vpop.f32.mrf.mxu1  ;;  %v3395_v34 = vpop.f32.mrf.mxu0 }
 0x27d   :  { %v1335_v12 = vrot.slane %v1043_v16, 7  ;;  %v3399_v22 = vsel %vm599_vm5, %v1332_v63, %v1334_v37 }
 0x27e   :  { %v1045_v55 = vpop.f32.mrf.mxu1  ;;  %v3401_v21 = vpop.f32.mrf.mxu0 }
 0x27f   :  { %v1336_v39 = vrot.slane %v1045_v55, 7  ;;  %v3405_v7 = vsel %vm599_vm5, %v1333_v8, %v1335_v12  ;;  %v2751_v8 = vld [vmem:[#allocation8 + $0x80] ss:$8 sps:$4 sm:$0xff]  }
 0x280   :  { %3974 = vst [vmem:[#allocation17_spill] sm:$0xff] %v3405_v7  ;;  %v1049_v26 = vpop.f32.mrf.mxu1  ;;  %v3407_v58 = vpop.f32.mrf.mxu0  ;;  %2254 = vmatpush2.bf16.msra.mxu0 %v2751_v8  ;;  %v1616_v8 = vrot.slane %v3345_v30, 1 }
 0x281   :  { %v1337_v25 = vrot.slane %v1049_v26, 7  ;;  %v3411_v29 = vsel %vm599_vm5, %v1334_v37, %v1336_v39 }
 0x282   :  { %3975 = vst [vmem:[#allocation18_spill] sm:$0xff] %v3411_v29  ;;  %v1051_v40 = vpop.f32.mrf.mxu1  ;;  %v3413_v52 = vpop.f32.mrf.mxu0  ;;  %v1672_v30 = vsel %vm793_vm11, %v1616_v8, %v1618_v44 }
 0x283   :  { %v1338_v48 = vrot.slane %v1051_v40, 7  ;;  %v3417_v42 = vsel %vm599_vm5, %v1335_v12, %v1337_v25 }
 0x284   :  { %v1053_v41 = vpop.f32.mrf.mxu1  ;;  %v3419_v60 = vpop.f32.mrf.mxu0 }
 0x285   :  { %v1339_v54 = vrot.slane %v1053_v41, 7  ;;  %v3423_v57 = vsel %vm599_vm5, %v1336_v39, %v1338_v48 }
 0x286   :  { %v1055_v59 = vpop.f32.mrf.mxu1  ;;  %v3425_v46 = vpop.f32.mrf.mxu0 }
 0x287   :  { %v1340_v11 = vrot.slane %v1055_v59, 7  ;;  %v3429_v61 = vsel %vm599_vm5, %v1337_v25, %v1339_v54  ;;  %v1619_v59 = vrot.slane %v3365_v51, 1 }
 0x288   :  { %3976 = vst [vmem:[#allocation19_spill] sm:$0xff] %v3429_v61  ;;  %v1059_v63 = vpop.f32.mrf.mxu1  ;;  %v3431_v33 = vpop.f32.mrf.mxu0  ;;  %v1623_v61 = vrot.slane %v3389_v17, 1  ;;  %v3523_v17 = vmul.f32 %v3122_v20, %v1672_v30  ;;  %v1627_v30 = vrot.slane %v3413_v52, 1 }
 0x289   :  { %v1341_v19 = vrot.slane %v1059_v63, 7  ;;  %v3435_v31 = vsel %vm599_vm5, %v1338_v48, %v1340_v11  ;;  %v1673_v13 = vsel %vm793_vm11, %v1617_v53, %v1619_v59 }
 0x28a   :  { %3977 = vst [vmem:[#allocation20_spill] sm:$0xff] %v3435_v31  ;;  %v1061_v38 = vpop.f32.mrf.mxu1  ;;  %v3437_v37 = vpop.f32.mrf.mxu0 }
 0x28b   :  { %v1342_v16 = vrot.slane %v1061_v38, 7  ;;  %v3441_v12 = vsel %vm599_vm5, %v1339_v54, %v1341_v19 }
 0x28c   :  { %v1063_v15 = vpop.f32.mrf.mxu1  ;;  %v3443_v55 = vpop.f32.mrf.mxu0 }
 0x28d   :  { %v1343_v24 = vrot.slane %v1063_v15, 7  ;;  %v3447_v39 = vsel %vm599_vm5, %v1340_v11, %v1342_v16 }
 0x28e   :  { %v1065_v26 = vpop.f32.mrf.mxu1  ;;  %v3449_v25 = vpop.f32.mrf.mxu0 }
 0x28f   :  { %v1344_v32 = vrot.slane %v1065_v26, 7  ;;  %v3453_v40 = vsel %vm599_vm5, %v1341_v19, %v1343_v24 }
 0x290   :  { %3978 = vst [vmem:[#allocation21_spill] sm:$0xff] %v3453_v40  ;;  %v1069_v56 = vpop.f32.mrf.mxu1  ;;  %v3455_v48 = vpop.f32.mrf.mxu0 }
 0x291   :  { %v1345_v47 = vrot.slane %v1069_v56, 7  ;;  %v3459_v41 = vsel %vm599_vm5, %v1342_v16, %v1344_v32  ;;  %v1742_v16 = vld [vmem:[%s3949_s4] sm:$0x3] }
 0x292   :  { %3979 = vst [vmem:[#allocation22_spill] sm:$0xff] %v3459_v41  ;;  %v1071_v54 = vpop.f32.mrf.mxu1  ;;  %v3462_v5 = vpop.f32.mrf.mxu0  ;;  %v3481_v26 = vrot.slane %v1742_v16, %v2930_v2  ;;  %v3496_v35 = vrot.slane %v1742_v16, %v2933_v3  ;;  %v1620_v2 = vrot.slane %v3371_v9, 1  ;;  %v1621_v41 = vrot.slane %v3377_v50, 1 }
 0x293   :  { %v1346_v11 = vrot.slane %v1071_v54, 7  ;;  %v3467_v63 = vsel %vm599_vm5, %v1343_v24, %v1345_v47  ;;  %v3983_v50 = vrot.slane %v3343_v0, 1 }
 0x294   :  { %v1073_v19 = vpop.f32.mrf.mxu1  ;;  %v3470_v38 = vpop.f32.mrf.mxu0 }
 0x295   :  { %v1347_v15 = vrot.slane %v1073_v19, 7  ;;  %v3478_v51 = vsel %vm599_vm5, %v1344_v32, %v1346_v11  ;;  %v3520_v3 = vsel %vm793_vm11, %v3983_v50, %v1617_v53 }
 0x296   :  { %v1075_v56 = vpop.f32.mrf.mxu1  ;;  %v3486_v54 = vpop.f32.mrf.mxu0 }
 0x297   :  { %v1348_v19 = vrot.slane %v1075_v56, 7  ;;  %v3493_v32 = vsel %vm599_vm5, %v1345_v47, %v1347_v15  ;;  %v3981_v56 = vrot.slane %v3339_v28, 1 }
 0x298   :  { %3980 = vst [vmem:[#allocation23_spill] sm:$0xff] %v3493_v32  ;;  %v1079_v40 = vpop.f32.mrf.mxu1  ;;  %v3501_v31 = vpop.f32.mrf.mxu0  ;;  %v3550_v32 = vsel %vm793_vm11, %v1619_v59, %v1621_v41 }
 0x299   :  { %v1349_v49 = vrot.slane %v1079_v40, 7  ;;  %v3508_v47 = vsel %vm793_vm11, %v3981_v56, %v1616_v8  ;;  %v3512_v16 = vsel %vm599_vm5, %v1346_v11, %v1348_v19  ;;  %v3526_v40 = vmul.f32 %v3122_v20, %v1673_v13 }
 0x29a   :  { %3982 = vst [vmem:[#allocation24_spill] sm:$0xff] %v3512_v16  ;;  %v1081_v24 = vpop.f32.mrf.mxu1  ;;  %v3514_v9 = vpop.f32.mrf.mxu0  ;;  %v3530_v8 = vmul.f32 %v3108_v6, %v3369_v18  ;;  %v1668_v11 = vsel %vm793_vm11, %v1620_v2, %v1622_v45  ;;  %v1626_v56 = vrot.slane %v3407_v58, 1  ;;  %v3542_v13 = vsel %vm793_vm11, %v1618_v44, %v1620_v2 }
 0x29b   :  { %v1350_v16 = vrot.slane %v1081_v24, 7  ;;  %v3537_v53 = vsel %vm599_vm5, %v1347_v15, %v1349_v49  ;;  %v3546_v18 = vmul.f32 %v3108_v6, %v3375_v10  ;;  %v1669_v58 = vsel %vm793_vm11, %v1621_v41, %v1623_v61 }
 0x29c   :  { %v1083_v50 = vpop.f32.mrf.mxu1  ;;  %v1624_v15 = vrot.slane %v3395_v34, 1  ;;  %v3555_v52 = vpop.f32.mrf.mxu0  ;;  %v1625_v44 = vrot.slane %v3401_v21, 1  ;;  %v1630_v10 = vrot.slane %v3431_v33, 1  ;;  %v3566_v59 = vmul.f32 %v3122_v20, %v1668_v11 }
 0x29d   :  { %v1351_v24 = vrot.slane %v1083_v50, 7  ;;  %v3559_v2 = vsel %vm599_vm5, %v1348_v19, %v1350_v16  ;;  %v3570_v41 = vmul.f32 %v3108_v6, %v3393_v23  ;;  %v1631_v50 = vrot.slane %v3437_v37, 1 }
 0x29e   :  { %v3563_v29 = vpop.f32.mrf.mxu1  ;;  %v1664_v34 = vsel %vm793_vm11, %v1624_v15, %v1626_v56  ;;  %v1665_v33 = vsel %vm793_vm11, %v1625_v44, %v1627_v30  ;;  %v1628_v11 = vrot.slane %v3419_v60, 1  ;;  %v3586_v23 = vmul.f32 %v3122_v20, %v1669_v58  ;;  %v3593_v19 = vpop.f32.mrf.mxu0 }
 0x29f   :  { %3984 = vst [vmem:[#allocation25_spill] sm:$0xff] %v3570_v41  ;;  %v3578_v21 = vsel %vm599_vm5, %v1349_v49, %v1351_v24  ;;  %v3590_v41 = vmul.f32 %v3108_v6, %v3399_v22  ;;  %v1629_v37 = vrot.slane %v3425_v46, 1  ;;  %v3987_v60 = vrot.slane %v3563_v29, 7 }
 0x2a0   :  { %3985 = vst [vmem:[#allocation26_spill] sm:$0xff] %v3578_v21  ;;  %v3583_v7 = vpop.f32.mrf.mxu1  ;;  %v3598_v21 = vsel %vm793_vm11, %v1622_v45, %v1624_v15  ;;  %v1660_v22 = vsel %vm793_vm11, %v1628_v11, %v1630_v10  ;;  %v3613_v49 = vsel %vm793_vm11, %v1623_v61, %v1625_v44  ;;  %v3616_v45 = vmul.f32 %v3122_v20, %v1664_v34 }
 0x2a1   :  { %3986 = vst [vmem:[#allocation27_spill] sm:$0xff] %v3590_v41  ;;  %v3604_v58 = vsel %vm599_vm5, %v1350_v16, %v3987_v60  ;;  %v1634_v41 = vrot.slane %v3455_v48, 1  ;;  %v1661_v15 = vsel %vm793_vm11, %v1629_v37, %v1631_v50  ;;  %v3621_v16 = vmul.f32 %v3122_v20, %v1665_v33 }
 0x2a2   :  { %3988 = vst [vmem:[#allocation28_spill] sm:$0xff] %v3604_v58  ;;  %v3609_v46 = vpop.f32.mrf.mxu1  ;;  %v3625_v60 = vmul.f32 %v3108_v6, %v3417_v42  ;;  %v3991_v48 = vrot.slane %v3583_v7, 7  ;;  %v1632_v61 = vrot.slane %v3443_v55, 1  ;;  %v1635_v44 = vrot.slane %v3462_v5, 1 }
 0x2a3   :  { %3989 = vst [vmem:[#allocation29_spill] sm:$0xff] %v3621_v16  ;;  %v3639_v33 = vsel %vm793_vm11, %v1626_v56, %v1628_v11  ;;  %v3643_v42 = vmul.f32 %v3108_v6, %v3423_v57  ;;  %v1633_v16 = vrot.slane %v3449_v25, 1  ;;  %v3651_v55 = vsel %vm793_vm11, %v1627_v30, %v1629_v37 }
 0x2a4   :  { %3990 = vst [vmem:[#allocation30_spill] sm:$0xff] %v3625_v60  ;;  %v3631_v58 = vsel %vm599_vm5, %v1351_v24, %v3991_v48  ;;  %v3635_v34 = vpop.f32.mrf.mxu1  ;;  %v3646_v60 = vpop.f32.mrf.mxu0  ;;  %v3654_v5 = vmul.f32 %v3122_v20, %v1660_v22  ;;  %v1656_v56 = vsel %vm793_vm11, %v1632_v61, %v1634_v41  ;;  %v1638_v11 = vrot.slane %v3501_v31, 1 }
 0x2a5   :  { %v3957_v24 = vrot.slane %v3635_v34, 7  ;;  %v3662_v25 = vmul.f32 %v3122_v20, %v1661_v15  ;;  %v3666_v48 = vmul.f32 %v3108_v6, %v3441_v12  ;;  %v1636_v30 = vrot.slane %v3470_v38, 1 }
 0x2a6   :  { %3992 = vst [vmem:[#allocation31_spill] sm:$0xff] %v3654_v5  ;;  %v3659_v57 = vpop.f32.mrf.mxu1  ;;  %v3995_v22 = vrot.slane %v3337_v27, 7  ;;  %v3678_v5 = vmul.f32 %v3108_v6, %v3447_v39  ;;  %v1657_v15 = vsel %vm793_vm11, %v1633_v16, %v1635_v44  ;;  %v1637_v12 = vrot.slane %v3486_v54, 1 }
 0x2a7   :  { %3993 = vst [vmem:[#allocation32_spill] sm:$0xff] %v3662_v25  ;;  %3994 = vst [vmem:[#allocation33_spill] sm:$0xff] %v3666_v48  ;;  %v3686_v27 = vsel %vm793_vm11, %v1630_v10, %v1632_v61  ;;  %v1639_v37 = vrot.slane %v3514_v9, 1  ;;  %v3689_v25 = vpop.f32.mrf.mxu0  ;;  %v3998_v39 = vrot.slane %v3659_v57, 7  ;;  %v3699_v54 = vsel %vm793_vm11, %v1631_v50, %v1633_v16 }
 0x2a8   :  { %v1387_v31 = vsel %vm599_vm5, %v3957_v24, %v3995_v22  ;;  %v1535_v48 = vpop.f32.mrf.mxu1  ;;  %3996 = vst [vmem:[#allocation34_spill] sm:$0xff] %v3686_v27  ;;  %v3997_v22 = vrot.slane %v3341_v62, 7  ;;  %v1652_v10 = vsel %vm793_vm11, %v1636_v30, %v1638_v11  ;;  %v3709_v62 = vmul.f32 %v3108_v6, %v3467_v63 }
 0x2a9   :  { %v1389_v38 = vmul.f32 %v3108_v6, %v1387_v31  ;;  %v3702_v31 = vmul.f32 %v3122_v20, %v1656_v56  ;;  %v3717_v50 = vsel %vm793_vm11, %v1634_v41, %v1636_v30  ;;  %v3721_v16 = vmul.f32 %v3108_v6, %v3478_v51 }
 0x2aa   :  { %v1388_v24 = vsel %vm599_vm5, %v3998_v39, %v3997_v22  ;;  %v1537_v27 = vpop.f32.mrf.mxu1  ;;  %v1642_v22 = vrot.slane %v3646_v60, 1  ;;  %v3713_v39 = vmul.f32 %v3122_v20, %v1657_v15  ;;  %v3727_v60 = vsel %vm793_vm11, %v1635_v44, %v1637_v12 }
 0x2ab   :  { %v1536_v9 = vadd.f32 %v1535_v48, %v1389_v38  ;;  %v1390_v61 = vmul.f32 %v3108_v6, %v1388_v24  ;;  %v1640_v24 = vrot.slane %v3555_v52, 1  ;;  %v1653_v15 = vsel %vm793_vm11, %v1637_v12, %v1639_v37  ;;  %v1320_v38 = vpop.f32.mrf.mxu0 }
 0x2ac   :  { %v1539_v63 = vpop.f32.mrf.mxu1  ;;  %v3733_v30 = vmul.f32 %v3122_v20, %v1652_v10  ;;  %v3737_v51 = vmul.f32 %v3108_v6, %v3537_v53  ;;  %v1354_v52 = vrot.slane %v3609_v46, 7  ;;  %v1643_v44 = vrot.slane %v3689_v25, 1 }
 0x2ad   :  { %v1710_v56 = vadd.f32 %v3508_v47, %v1536_v9  ;;  %v1538_v48 = vadd.f32 %v1537_v27, %v1390_v61  ;;  %v1540_v41 = vadd.f32 %v1539_v63, %v3355_v43  ;;  %v1641_v47 = vrot.slane %v3593_v19, 1  ;;  %v1322_v25 = vpop.f32.mrf.mxu0 }
 0x2ae   :  { %v1541_v9 = vpop.f32.mrf.mxu1  ;;  %v1648_v12 = vsel %vm793_vm11, %v1640_v24, %v1642_v22  ;;  %v1644_v53 = vrot.slane %v1320_v38, 1  ;;  %v3749_v19 = vmul.f32 %v3122_v20, %v1653_v15  ;;  %v3753_v46 = vsel %vm793_vm11, %v1638_v11, %v1640_v24 }
 0x2af   :  { %v1711_v27 = vadd.f32 %v3520_v3, %v1538_v48  ;;  %v1754_v43 = vadd.f32 %v3496_v35, %v1710_v56  ;;  %v1712_v10 = vadd.f32 %v3523_v17, %v1540_v41  ;;  %v1542_v61 = vadd.f32 %v1541_v9, %v3363_v4 }
 0x2b0   :  { %v1545_v63 = vpop.f32.mrf.mxu1  ;;  %v3757_v3 = vmul.f32 %v3108_v6, %v3559_v2  ;;  %v1649_v15 = vsel %vm793_vm11, %v1641_v47, %v1643_v44  ;;  %v3767_v11 = vsel %vm793_vm11, %v1639_v37, %v1641_v47  ;;  %v3770_v2 = vmul.f32 %v3122_v20, %v1648_v12 }
 0x2b1   :  { %v1755_v56 = vadd.f32 %v3481_v26, %v1711_v27  ;;  %v1756_v17 = vadd.f32 %v3496_v35, %v1712_v10  ;;  %v1713_v4 = vadd.f32 %v3526_v40, %v1542_v61  ;;  %v1546_v48 = vadd.f32 %v1545_v63, %v3530_v8 }
 0x2b2   :  { %v1547_v38 = vpop.f32.mrf.mxu1  ;;  %v3999_v24 = vrot.slane %v3563_v29, 7  ;;  %v1786_v27 = vmax.f32 %v1754_v43, 0.0  ;;  %v4000_v10 = vrot.slane %v3339_v28, 1  ;;  %v1645_v47 = vrot.slane %v1322_v25, 1 }
 0x2b3   :  { %v1788_v40 = vmax.f32 %v1756_v17, 0.0  ;;  %v1757_v8 = vadd.f32 %v3481_v26, %v1713_v4  ;;  %v1548_v9 = vadd.f32 %v1547_v38, %v3546_v18  ;;  %v1714_v12 = vadd.f32 %v3542_v13, %v1546_v48 }
 0x2b4   :  { %v1360_v41 = vsel %vm599_vm5, %v3999_v24, %v1354_v52  ;;  %v1676_v37 = vsel %vm793_vm11, %v1644_v53, %v4000_v10  ;;  %v1549_v61 = vpop.f32.mrf.mxu1  ;;  %v3785_v29 = vmul.f32 %v3108_v6, %v3631_v58  ;;  %v1787_v63 = vmax.f32 %v1755_v56, 0.0 }
 0x2b5   :  { %v1818_v43 = vadd.f32 %v1788_v40, %v1786_v27  ;;  %v1789_v17 = vmax.f32 %v1757_v8, 0.0  ;;  %v3788_v4 = vmul.f32 %v3122_v20, %v1649_v15  ;;  %v1715_v18 = vadd.f32 %v3550_v32, %v1548_v9  ;;  %v4004_v40 = vld [vmem:[#allocation25_spill] sm:$0xff] }
 0x2b6   :  { %v1550_v28 = vadd.f32 %v1549_v61, %v3381_v14  ;;  %v1551_v38 = vpop.f32.mrf.mxu1  ;;  %v3794_v25 = vsel %vm793_vm11, %v1642_v22, %v1644_v53  ;;  %v3797_v13 = vmul.f32 %v3108_v6, %v1360_v41  ;;  %v4001_v56 = vrot.slane %v3635_v34, 7 }
 0x2b7   :  { %v1819_v58 = vrot.slane %v1818_v43, 4  ;;  %v1825_v48 = vadd.f32 %v1789_v17, %v1787_v63  ;;  %v4002_v24 = vrot.slane %v3583_v7, 7  ;;  %v3808_v14 = vmul.f32 %v3122_v20, %v1676_v37  ;;  %v4006_v17 = vld [vmem:[#allocation27_spill] sm:$0xff] }
 0x2b8   :  { %v4003_v32 = vrot.slane %v3343_v0, 1  ;;  %v1758_v6 = vadd.f32 %v3496_v35, %v1714_v12  ;;  %v1716_v53 = vadd.f32 %v3566_v59, %v1550_v28  ;;  %v1552_v34 = vadd.f32 %v1551_v38, %v3387_v36  ;;  %v1555_v41 = vpop.f32.mrf.mxu1 }
 0x2b9   :  { %v3805_v15 = vsel %vm599_vm5, %v4002_v24, %v4001_v56  ;;  %v1820_v7 = vadd.f32 %v1819_v58, %v1818_v43  ;;  %v1826_v27 = vrot.slane %v1825_v48, 4  ;;  %v1556_v8 = vadd.f32 %v1555_v41, %v4004_v40 }
 0x2ba   :  { %v1677_v22 = vsel %vm793_vm11, %v1645_v47, %v4003_v32  ;;  %v3820_v9 = vsel %vm793_vm11, %v1643_v44, %v1645_v47  ;;  %v1759_v0 = vadd.f32 %v3481_v26, %v1715_v18  ;;  %v1760_v10 = vadd.f32 %v3496_v35, %v1716_v53  ;;  %v1557_v12 = vpop.f32.mrf.mxu1 }
 0x2bb   :  { %v1717_v37 = vadd.f32 %v3586_v23, %v1552_v34  ;;  %v4005_v59 = vrot.slane %v3659_v57, 7  ;;  %v1821_v61 = vrot.slane %v1820_v7, 2  ;;  %v1827_v63 = vadd.f32 %v1826_v27, %v1825_v48 }
 0x2bc   :  { %v1718_v43 = vadd.f32 %v3598_v21, %v1556_v8  ;;  %v1558_v44 = vadd.f32 %v1557_v12, %v4006_v17  ;;  %v1790_v47 = vmax.f32 %v1758_v6, 0.0  ;;  %v1792_v28 = vmax.f32 %v1760_v10, 0.0  ;;  %v1559_v38 = vpop.f32.mrf.mxu1  ;;  %v4007_v21 = vld [vmem:[#allocation17_spill] sm:$0xff]  ;;  %v4009_v12 = vld [vmem:[#allocation30_spill] sm:$0xff] }
 0x2bd   :  { %v3829_v36 = vsel %vm599_vm5, %v1354_v52, %v4005_v59  ;;  %v1761_v18 = vadd.f32 %v3481_v26, %v1717_v37  ;;  %v3835_v23 = vmul.f32 %v3122_v20, %v1677_v22  ;;  %v1822_v58 = vadd.f32 %v1821_v61, %v1820_v7  ;;  %v4008_v7 = vld [vmem:[#allocation18_spill] sm:$0xff] }
 0x2be   :  { %v1828_v57 = vrot.slane %v1827_v63, 2  ;;  %v1762_v1 = vadd.f32 %v3496_v35, %v1718_v43  ;;  %v1719_v52 = vadd.f32 %v3613_v49, %v1558_v44  ;;  %v1791_v56 = vmax.f32 %v1759_v0, 0.0  ;;  %v1561_v53 = vpop.f32.mrf.mxu1 }
 0x2bf   :  { %v1832_v48 = vadd.f32 %v1792_v28, %v1790_v47  ;;  %v1793_v24 = vmax.f32 %v1761_v18, 0.0  ;;  %v1560_v32 = vadd.f32 %v1559_v38, %v4007_v21  ;;  %v1823_v6 = vrot.slane %v1822_v58, 1 }
 0x2c0   :  { %v1829_v34 = vadd.f32 %v1828_v57, %v1827_v63  ;;  %v1794_v41 = vmax.f32 %v1762_v1, 0.0  ;;  %v1763_v27 = vadd.f32 %v3481_v26, %v1719_v52  ;;  %v1562_v8 = vadd.f32 %v1561_v53, %v4008_v7  ;;  %v1565_v10 = vpop.f32.mrf.mxu1  ;;  %v4010_v63 = vld [vmem:[#allocation29_spill] sm:$0xff] }
 0x2c1   :  { %v1833_v40 = vrot.slane %v1832_v48, 4  ;;  %v1839_v20 = vadd.f32 %v1793_v24, %v1791_v56  ;;  %v1720_v22 = vadd.f32 %v3616_v45, %v1560_v32  ;;  %v1824_v37 = vadd.f32 %v1823_v6, %v1822_v58 }
 0x2c2   :  { %v1830_v49 = vrot.slane %v1829_v34, 1  ;;  %v1795_v0 = vmax.f32 %v1763_v27, 0.0  ;;  %v1566_v59 = vadd.f32 %v1565_v10, %v4009_v12  ;;  %v1721_v44 = vadd.f32 %v4010_v63, %v1562_v8  ;;  %v1567_v47 = vpop.f32.mrf.mxu1 }
 0x2c3   :  { %v1834_v61 = vadd.f32 %v1833_v40, %v1832_v48  ;;  %v1840_v43 = vrot.slane %v1839_v20, 4  ;;  %v1764_v17 = vadd.f32 %v3496_v35, %v1720_v22  ;;  %v1930_v28 = vmul.f32 0.0625, %v1824_v37 }
 0x2c4   :  { %v1831_v18 = vadd.f32 %v1830_v49, %v1829_v34  ;;  %v1722_v38 = vadd.f32 %v3639_v33, %v1566_v59  ;;  %v1568_v45 = vadd.f32 %v1567_v47, %v3643_v42  ;;  %v1765_v52 = vadd.f32 %v3481_v26, %v1721_v44  ;;  %v1569_v56 = vpop.f32.mrf.mxu1 }
 0x2c5   :  { %v1835_v57 = vrot.slane %v1834_v61, 2  ;;  %v1841_v1 = vadd.f32 %v1840_v43, %v1839_v20  ;;  %v1796_v58 = vmax.f32 %v1764_v17, 0.0  ;;  %v1946_v24 = vpack.c.bf16 %v1930_v28, %v1930_v28  ;;  %v4012_v43 = vld [vmem:[#allocation20_spill] sm:$0xff] }
 0x2c6   :  { %v1931_v48 = vmul.f32 0.0625, %v1831_v18  ;;  %v1766_v21 = vadd.f32 %v3496_v35, %v1722_v38  ;;  %v1723_v32 = vadd.f32 %v3651_v55, %v1568_v45  ;;  %v1797_v34 = vmax.f32 %v1765_v52, 0.0  ;;  %v1571_v40 = vpop.f32.mrf.mxu1  ;;  %v4011_v55 = vld [vmem:[#allocation19_spill] sm:$0xff]  ;;  %v4014_v45 = vld [vmem:[#allocation32_spill] sm:$0xff] }
 0x2c7   :  { %v1836_v53 = vadd.f32 %v1835_v57, %v1834_v61  ;;  %v1842_v6 = vrot.slane %v1841_v1, 2  ;;  %v1846_v27 = vadd.f32 %v1796_v58, %v1794_v41  ;;  %v2022_v33 = vunpack.c.l.b16 %v1946_v24  ;;  %v4013_v18 = vld [vmem:[#allocation31_spill] sm:$0xff] }
 0x2c8   :  { %v1947_v22 = vpack.c.bf16 %v1931_v48, %v1931_v48  ;;  %v1798_v42 = vmax.f32 %v1766_v21, 0.0  ;;  %v1767_v20 = vadd.f32 %v3481_v26, %v1723_v32  ;;  %v1853_v37 = vadd.f32 %v1797_v34, %v1795_v0  ;;  %v1575_v49 = vpop.f32.mrf.mxu1 }
 0x2c9   :  { %v1837_v7 = vrot.slane %v1836_v53, 1  ;;  %v1843_v8 = vadd.f32 %v1842_v6, %v1841_v1  ;;  %v1847_v10 = vrot.slane %v1846_v27, 4  ;;  %v1570_v61 = vadd.f32 %v1569_v56, %v4011_v55  ;;  %v4015_v1 = vld [vmem:[#allocation33_spill] sm:$0xff]  ;;  %v4016_v6 = vld [vmem:[#allocation34_spill] sm:$0xff] }
 0x2ca   :  { %v3852_v12 = vunpack.c.l.b16 %v1947_v22  ;;  %v1799_v59 = vmax.f32 %v1767_v20, 0.0  ;;  %v1572_v41 = vadd.f32 %v1571_v40, %v4012_v43  ;;  %v1854_v47 = vrot.slane %v1853_v37, 4  ;;  %v1577_v28 = vpop.f32.mrf.mxu1 }
 0x2cb   :  { %v1838_v17 = vadd.f32 %v1837_v7, %v1836_v53  ;;  %v1844_v63 = vrot.slane %v1843_v8, 1  ;;  %v1848_v44 = vadd.f32 %v1847_v10, %v1846_v27  ;;  %v1724_v38 = vadd.f32 %v4013_v18, %v1570_v61 }
 0x2cc   :  { %v1725_v57 = vadd.f32 %v4014_v45, %v1572_v41  ;;  %v1576_v58 = vadd.f32 %v1575_v49, %v4015_v1  ;;  %v1578_v0 = vadd.f32 %v1577_v28, %v3678_v5  ;;  %v1855_v21 = vadd.f32 %v1854_v47, %v1853_v37  ;;  %v1579_v56 = vpop.f32.mrf.mxu1 }
 0x2cd   :  { %v1932_v52 = vmul.f32 0.0625, %v1838_v17  ;;  %v1845_v24 = vadd.f32 %v1844_v63, %v1843_v8  ;;  %v1849_v48 = vrot.slane %v1848_v44, 2  ;;  %v1768_v32 = vadd.f32 %v3496_v35, %v1724_v38 }
 0x2ce   :  { %v1769_v53 = vadd.f32 %v3481_v26, %v1725_v57  ;;  %v1726_v27 = vadd.f32 %v4016_v6, %v1576_v58  ;;  %v1727_v34 = vadd.f32 %v3699_v54, %v1578_v0  ;;  %v1856_v7 = vrot.slane %v1855_v21, 2  ;;  %v1581_v10 = vpop.f32.mrf.mxu1  ;;  %v4017_v0 = vld [vmem:[#allocation21_spill] sm:$0xff] }
 0x2cf   :  { %v1948_v40 = vpack.c.bf16 %v1932_v52, %v1932_v52  ;;  %v1933_v22 = vmul.f32 0.0625, %v1845_v24  ;;  %v1850_v20 = vadd.f32 %v1849_v48, %v1848_v44  ;;  %v1800_v49 = vmax.f32 %v1768_v32, 0.0  ;;  %v4018_v24 = vld [vmem:[#allocation22_spill] sm:$0xff] }
 0x2d0   :  { %v1801_v5 = vmax.f32 %v1769_v53, 0.0  ;;  %v1770_v8 = vadd.f32 %v3496_v35, %v1726_v27  ;;  %v1771_v37 = vadd.f32 %v3481_v26, %v1727_v34  ;;  %v1857_v41 = vadd.f32 %v1856_v7, %v1855_v21  ;;  %v1585_v17 = vpop.f32.mrf.mxu1 }
 0x2d1   :  { %v2024_v55 = vunpack.c.l.b16 %v1948_v40  ;;  %v1949_v61 = vpack.c.bf16 %v1933_v22, %v1933_v22  ;;  %v1851_v43 = vrot.slane %v1850_v20, 1  ;;  %v1860_v63 = vadd.f32 %v1800_v49, %v1798_v42 }
 0x2d2   :  { %v1867_v47 = vadd.f32 %v1801_v5, %v1799_v59  ;;  %v1802_v28 = vmax.f32 %v1770_v8, 0.0  ;;  %v1803_v54 = vmax.f32 %v1771_v37, 0.0  ;;  %v1858_v45 = vrot.slane %v1857_v41, 1  ;;  %v1587_v57 = vpop.f32.mrf.mxu1 }
 0x2d3   :  { %v3867_v18 = vsel %vm2038_vm12, %v2024_v55, %v2022_v33  ;;  %v3869_v44 = vunpack.c.l.b16 %v1949_v61  ;;  %v1852_v38 = vadd.f32 %v1851_v43, %v1850_v20  ;;  %v1861_v1 = vrot.slane %v1860_v63, 4 }
 0x2d4   :  { %v1868_v58 = vrot.slane %v1867_v47, 4  ;;  %v1580_v52 = vadd.f32 %v1579_v56, %v4017_v0  ;;  %v1582_v48 = vadd.f32 %v1581_v10, %v4018_v24  ;;  %v1859_v32 = vadd.f32 %v1858_v45, %v1857_v41  ;;  %v1589_v53 = vpop.f32.mrf.mxu1 }
 0x2d5   :  { %v1934_v21 = vmul.f32 0.0625, %v1852_v38  ;;  %v1586_v42 = vadd.f32 %v1585_v17, %v3709_v62  ;;  %v1588_v59 = vadd.f32 %v1587_v57, %v3721_v16  ;;  %v1862_v33 = vadd.f32 %v1861_v1, %v1860_v63  ;;  %v4019_v63 = vld [vmem:[#allocation23_spill] sm:$0xff] }
 0x2d6   :  { %v1869_v6 = vadd.f32 %v1868_v58, %v1867_v47  ;;  %v1728_v27 = vadd.f32 %v3702_v31, %v1580_v52  ;;  %v1729_v34 = vadd.f32 %v3713_v39, %v1582_v48  ;;  %v1935_v22 = vmul.f32 0.0625, %v1859_v32  ;;  %v1591_v7 = vpop.f32.mrf.mxu1  ;;  %v4020_v52 = vld [vmem:[#allocation24_spill] sm:$0xff] }
 0x2d7   :  { %v1950_v40 = vpack.c.bf16 %v1934_v21, %v1934_v21  ;;  %v1730_v20 = vadd.f32 %v3717_v50, %v1586_v42  ;;  %v1731_v56 = vadd.f32 %v3727_v60, %v1588_v59  ;;  %v1863_v10 = vrot.slane %v1862_v33, 2 }
 0x2d8   :  { %v1870_v49 = vrot.slane %v1869_v6, 2  ;;  %v1772_v62 = vadd.f32 %v3496_v35, %v1728_v27  ;;  %v1773_v16 = vadd.f32 %v3481_v26, %v1729_v34  ;;  %v1951_v8 = vpack.c.bf16 %v1935_v22, %v1935_v22  ;;  %v1595_v37 = vpop.f32.mrf.mxu1 }
 0x2d9   :  { %v3881_v5 = vunpack.c.l.b16 %v1950_v40  ;;  %v1774_v31 = vadd.f32 %v3496_v35, %v1730_v20  ;;  %v1775_v39 = vadd.f32 %v3481_v26, %v1731_v56  ;;  %v1864_v55 = vadd.f32 %v1863_v10, %v1862_v33 }
 0x2da   :  { %v1871_v61 = vadd.f32 %v1870_v49, %v1869_v6  ;;  %v1804_v50 = vmax.f32 %v1772_v62, 0.0  ;;  %v1805_v43 = vmax.f32 %v1773_v16, 0.0  ;;  %v3885_v60 = vunpack.c.l.b16 %v1951_v8  ;;  %v1597_v38 = vpop.f32.mrf.mxu1 }
 0x2db   :  { %v1806_v41 = vmax.f32 %v1774_v31, 0.0  ;;  %v1807_v17 = vmax.f32 %v1775_v39, 0.0  ;;  %v1590_v47 = vadd.f32 %v1589_v53, %v4019_v63  ;;  %v1865_v45 = vrot.slane %v1864_v55, 1 }
 0x2dc   :  { %v1872_v57 = vrot.slane %v1871_v61, 1  ;;  %v1874_v1 = vadd.f32 %v1804_v50, %v1802_v28  ;;  %v1881_v58 = vadd.f32 %v1805_v43, %v1803_v54  ;;  %v1592_v24 = vadd.f32 %v1591_v7, %v4020_v52  ;;  %v1599_v32 = vpop.f32.mrf.mxu1 }
 0x2dd   :  { %v1732_v0 = vadd.f32 %v3733_v30, %v1590_v47  ;;  %v1596_v48 = vadd.f32 %v1595_v37, %v3737_v51  ;;  %v1598_v21 = vadd.f32 %v1597_v38, %v3757_v3  ;;  %v1866_v42 = vadd.f32 %v1865_v45, %v1864_v55  ;;  %v4021_v47 = vld [vmem:[#allocation26_spill] sm:$0xff]  ;;  %v4022_v45 = vld [vmem:[#allocation28_spill] sm:$0xff] }
 0x2de   :  { %v1873_v59 = vadd.f32 %v1872_v57, %v1871_v61  ;;  %v1875_v33 = vrot.slane %v1874_v1, 4  ;;  %v1882_v6 = vrot.slane %v1881_v58, 4  ;;  %v1733_v27 = vadd.f32 %v3749_v19, %v1592_v24  ;;  %v1601_v30 = vpop.f32.mrf.mxu1 }
 0x2df   :  { %v1776_v53 = vadd.f32 %v3496_v35, %v1732_v0  ;;  %v1734_v28 = vadd.f32 %v3753_v46, %v1596_v48  ;;  %v1735_v54 = vadd.f32 %v3767_v11, %v1598_v21  ;;  %v1936_v34 = vmul.f32 0.0625, %v1866_v42 }
 0x2e0   :  { %v1937_v40 = vmul.f32 0.0625, %v1873_v59  ;;  %v1876_v22 = vadd.f32 %v1875_v33, %v1874_v1  ;;  %v1883_v51 = vadd.f32 %v1882_v6, %v1881_v58  ;;  %v1777_v3 = vadd.f32 %v3481_v26, %v1733_v27  ;;  %v1605_v10 = vpop.f32.mrf.mxu1 }
 0x2e1   :  { %v1808_v20 = vmax.f32 %v1776_v53, 0.0  ;;  %v1778_v56 = vadd.f32 %v3496_v35, %v1734_v28  ;;  %v1779_v7 = vadd.f32 %v3481_v26, %v1735_v54  ;;  %v1952_v49 = vpack.c.bf16 %v1936_v34, %v1936_v34 }
 0x2e2   :  { %v1953_v62 = vpack.c.bf16 %v1937_v40, %v1937_v40  ;;  %v1877_v19 = vrot.slane %v1876_v22, 2  ;;  %v1884_v16 = vrot.slane %v1883_v51, 2  ;;  %v1809_v8 = vmax.f32 %v1777_v3, 0.0  ;;  %v1607_v39 = vpop.f32.mrf.mxu1 }
 0x2e3   :  { %v1888_v46 = vadd.f32 %v1808_v20, %v1806_v41  ;;  %v1810_v11 = vmax.f32 %v1778_v56, 0.0  ;;  %v1811_v31 = vmax.f32 %v1779_v7, 0.0  ;;  %v3899_v37 = vunpack.c.l.b16 %v1952_v49 }
 0x2e4   :  { %v3901_v55 = vunpack.c.l.b16 %v1953_v62  ;;  %v1878_v61 = vadd.f32 %v1877_v19, %v1876_v22  ;;  %v1885_v50 = vadd.f32 %v1884_v16, %v1883_v51  ;;  %v1895_v63 = vadd.f32 %v1809_v8, %v1807_v17  ;;  %v1609_v42 = vpop.f32.mrf.mxu1 }
 0x2e5   :  { %v1889_v43 = vrot.slane %v1888_v46, 4  ;;  %v1600_v38 = vadd.f32 %v1599_v32, %v4021_v47  ;;  %v1602_v57 = vadd.f32 %v1601_v30, %v4022_v45  ;;  %v1606_v41 = vadd.f32 %v1605_v10, %v3785_v29 }
 0x2e6   :  { %v1879_v1 = vrot.slane %v1878_v61, 1  ;;  %v1886_v58 = vrot.slane %v1885_v50, 1  ;;  %v1608_v0 = vadd.f32 %v1607_v39, %v3797_v13  ;;  %v1896_v24 = vrot.slane %v1895_v63, 4 }
 0x2e7   :  { %v1890_v52 = vadd.f32 %v1889_v43, %v1888_v46  ;;  %v1736_v48 = vadd.f32 %v3770_v2, %v1600_v38  ;;  %v1737_v21 = vadd.f32 %v3788_v4, %v1602_v57  ;;  %v1738_v32 = vadd.f32 %v3794_v25, %v1606_v41  ;;  %v1611_v25 = vpop.f32.mrf.mxu1 }
 0x2e8   :  { %v1880_v17 = vadd.f32 %v1879_v1, %v1878_v61  ;;  %v1887_v59 = vadd.f32 %v1886_v58, %v1885_v50  ;;  %v1739_v33 = vadd.f32 %v3820_v9, %v1608_v0  ;;  %v1897_v53 = vadd.f32 %v1896_v24, %v1895_v63 }
 0x2e9   :  { %v1891_v6 = vrot.slane %v1890_v52, 2  ;;  %v1780_v29 = vadd.f32 %v3496_v35, %v1736_v48  ;;  %v1781_v13 = vadd.f32 %v3481_v26, %v1737_v21  ;;  %v1782_v2 = vadd.f32 %v3496_v35, %v1738_v32 }
 0x2ea   :  { %v1938_v27 = vmul.f32 0.0625, %v1880_v17  ;;  %v1939_v28 = vmul.f32 0.0625, %v1887_v59  ;;  %v1783_v4 = vadd.f32 %v3481_v26, %v1739_v33  ;;  %v1898_v30 = vrot.slane %v1897_v53, 2 }
 0x2eb   :  { %v1892_v54 = vadd.f32 %v1891_v6, %v1890_v52  ;;  %v1812_v34 = vmax.f32 %v1780_v29, 0.0  ;;  %v1813_v40 = vmax.f32 %v1781_v13, 0.0  ;;  %v1814_v51 = vmax.f32 %v1782_v2, 0.0 }
 0x2ec   :  { %v1954_v22 = vpack.c.bf16 %v1938_v27, %v1938_v27  ;;  %v1955_v9 = vpack.c.bf16 %v1939_v28, %v1939_v28  ;;  %v1815_v20 = vmax.f32 %v1783_v4, 0.0  ;;  %v1899_v56 = vadd.f32 %v1898_v30, %v1897_v53 }
 0x2ed   :  { %v1893_v3 = vrot.slane %v1892_v54, 1  ;;  %v1902_v7 = vadd.f32 %v1812_v34, %v1810_v11  ;;  %v1909_v10 = vadd.f32 %v1813_v40, %v1811_v31  ;;  %v1610_v19 = vadd.f32 %v1609_v42, %v3805_v15 }
 0x2ee   :  { %v2030_v49 = vunpack.c.l.b16 %v1954_v22  ;;  %v2031_v62 = vunpack.c.l.b16 %v1955_v9  ;;  %v1612_v16 = vadd.f32 %v1611_v25, %v3829_v36  ;;  %v1900_v8 = vrot.slane %v1899_v56, 1 }
 0x2ef   :  { %v1894_v46 = vadd.f32 %v1893_v3, %v1892_v54  ;;  %v1903_v39 = vrot.slane %v1902_v7, 4  ;;  %v1910_v61 = vrot.slane %v1909_v10, 4  ;;  %v1740_v50 = vadd.f32 %v3808_v14, %v1610_v19 }
 0x2f0   :  { %v1741_v43 = vadd.f32 %v3835_v23, %v1612_v16  ;;  %v2041_v63 = vsel %vm2040_vm13, %v3881_v5, %v3867_v18  ;;  %v2052_v11 = vsel %vm2038_vm12, %v3869_v44, %v3852_v12  ;;  %v1901_v15 = vadd.f32 %v1900_v8, %v1899_v56 }
 0x2f1   :  { %v1940_v31 = vmul.f32 0.0625, %v1894_v46  ;;  %v1904_v47 = vadd.f32 %v1903_v39, %v1902_v7  ;;  %v1911_v36 = vadd.f32 %v1910_v61, %v1909_v10  ;;  %v1784_v38 = vadd.f32 %v3496_v35, %v1740_v50  ;;  %v1994_v50 = vld [vmem:[%s3951_s6] sm:$0x3] }
 0x2f2   :  { %v1785_v45 = vadd.f32 %v3481_v26, %v1741_v43  ;;  %v2043_v14 = vsel %vm2042_vm14, %v3899_v37, %v2041_v63  ;;  %v2053_v23 = vsel %vm2040_vm13, %v3885_v60, %v2052_v11  ;;  %v1941_v18 = vmul.f32 0.0625, %v1901_v15  ;;  %v4023_v43 = vld [vmem:[#allocation16_spill] sm:$0xff]  ;;  %v4024_v11 = vld [vmem:[#allocation15_spill] sm:$0xff] }
 0x2f3   :  { %v1956_v57 = vpack.c.bf16 %v1940_v31, %v1940_v31  ;;  %v1905_v5 = vrot.slane %v1904_v47, 2  ;;  %v1912_v1 = vrot.slane %v1911_v36, 2  ;;  %v1816_v58 = vmax.f32 %v1784_v38, 0.0 }
 0x2f4   :  { %v1817_v12 = vmax.f32 %v1785_v45, 0.0  ;;  %v2045_v44 = vsel %vm2044_vm15, %v2030_v49, %v2043_v14  ;;  %v2054_v41 = vsel %vm2042_vm14, %v3901_v55, %v2053_v23  ;;  %v1957_v52 = vpack.c.bf16 %v1941_v18, %v1941_v18 }
 0x2f5   :  { %v2032_v35 = vunpack.c.l.b16 %v1956_v57  ;;  %v1906_v0 = vadd.f32 %v1905_v5, %v1904_v47  ;;  %v1913_v26 = vadd.f32 %v1912_v1, %v1911_v36  ;;  %v1916_v24 = vadd.f32 %v1816_v58, %v1814_v51 }
 0x2f6   :  { %v1923_v37 = vadd.f32 %v1817_v12, %v1815_v20  ;;  %v2055_v48 = vsel %vm2044_vm15, %v2031_v62, %v2054_v41  ;;  %v2033_v42 = vunpack.c.l.b16 %v1957_v52  ;;  %v1999_v63 = vrot.slane %v1994_v50, %v4023_v43 }
 0x2f7   :  { %v1907_v60 = vrot.slane %v1906_v0, 1  ;;  %v1914_v21 = vrot.slane %v1913_v26, 1  ;;  %v2047_v17 = vsel %vm2046_vm0, %v2032_v35, %v2045_v44  ;;  %v1917_v59 = vrot.slane %v1916_v24, 4 }
 0x2f8   :  { %v1924_v32 = vrot.slane %v1923_v37, 4  ;;  %v2056_v53 = vsel %vm2046_vm0, %v2033_v42, %v2055_v48  ;;  %v2003_v31 = vrot.slane %v1994_v50, %v4024_v11 }
 0x2f9   :  { %v1908_v33 = vadd.f32 %v1907_v60, %v1906_v0  ;;  %v1915_v6 = vadd.f32 %v1914_v21, %v1913_v26  ;;  %v1918_v55 = vadd.f32 %v1917_v59, %v1916_v24 }
 0x2fa   :  { %v1925_v29 = vadd.f32 %v1924_v32, %v1923_v37 }
 0x2fb   :  { %v1942_v13 = vmul.f32 0.0625, %v1908_v33  ;;  %v1943_v27 = vmul.f32 0.0625, %v1915_v6  ;;  %v1919_v28 = vrot.slane %v1918_v55, 2 }
 0x2fc   :  { %v1926_v2 = vrot.slane %v1925_v29, 2 }
 0x2fd   :  { %v1958_v4 = vpack.c.bf16 %v1942_v13, %v1942_v13  ;;  %v1959_v54 = vpack.c.bf16 %v1943_v27, %v1943_v27  ;;  %v1920_v30 = vadd.f32 %v1919_v28, %v1918_v55 }
 0x2fe   :  { %v1927_v34 = vadd.f32 %v1926_v2, %v1925_v29 }
 0x2ff   :  { %v2034_v40 = vunpack.c.l.b16 %v1958_v4  ;;  %v2035_v25 = vunpack.c.l.b16 %v1959_v54  ;;  %v1921_v22 = vrot.slane %v1920_v30, 1 }
 0x300   :  { %v1928_v9 = vrot.slane %v1927_v34, 1 }
 0x301   :  { %v2049_v51 = vsel %vm2048_vm1, %v2034_v40, %v2047_v17  ;;  %v2057_v20 = vsel %vm2048_vm1, %v2035_v25, %v2056_v53  ;;  %v1922_v3 = vadd.f32 %v1921_v22, %v1920_v30 }
 0x302   :  { %v1929_v56 = vadd.f32 %v1928_v9, %v1927_v34 }
 0x303   :  { %v1944_v7 = vmul.f32 0.0625, %v1922_v3 }
 0x304   :  { %v1945_v10 = vmul.f32 0.0625, %v1929_v56 }
 0x305   :  { %v1960_v49 = vpack.c.bf16 %v1944_v7, %v1944_v7 }
 0x306   :  { %v1961_v62 = vpack.c.bf16 %v1945_v10, %v1945_v10 }
 0x307   :  { %v2036_v19 = vunpack.c.l.b16 %v1960_v49 }
 0x308   :  { %v2037_v16 = vunpack.c.l.b16 %v1961_v62 }
 0x309   :  { %v2051_v46 = vsel %vm2050_vm2, %v2036_v19, %v2049_v51 }
 0x30a   :  { %v2058_v8 = vsel %vm2050_vm2, %v2037_v16, %v2057_v20  ;;  %v2059_v61 = vpack.c.b16 %v2051_v46, %v2051_v46 }
 0x30b   :  { %v2060_v39 = vpack.c.b16 %v2058_v8, %v2058_v8 }
 0x30d   :  { %2255 = vmatprep.mubr.bf16.mxu0 %v2060_v39 }
 0x30e   :  { %2256 = vmatmul.mubr.bf16.vlgmr.msra.gmra.mxu0 %v2059_v61 }
 0x3ce   :  { %v2257_v15 = vpop.f32.mrf.mxu0 }
 0x3cf   :  { %v2258_v47 = vadd.f32 %v2257_v15, %v1999_v63 }
 0x3d0   :  { %v2259_v36 = vpop.f32.mrf.mxu0 }
 0x3d1   :  { %2264 = vst [vmem:[#allocation10] sm:$0xff] %v2258_v47  ;;  %v2260_v38 = vadd.f32 %v2259_v36, %v2003_v31 }
 0x3d2   :  { %v2261_v45 = vpop.f32.mrf.mxu0 }
 0x3d3   :  { %2265 = vst [vmem:[#allocation10 + $0x8] sm:$0xff] %v2260_v38 }
 0x3d4   :  { %v2262_v14 = vpop.f32.mrf.mxu0 }
 0x3d5   :  { %2845 = shalt.err (!%p2842_p10)
}
 0x3d6   :  { %2275 = dma.vmem_to_hbm [thread:$0]  %s2273_s26, 256, %s3952_s7, [#allocation4]  }
 0x3d7   :  { %2860 = dma.done.wait [#allocation4], 256  }
 0x3d8   :  { %2861 = vsyncadd [#allocation4], 4294967040 }
 0x3d9   :  { %2279 = vsyncpa [#allocation3], 1 }
 0x3da   :  { %2280 = vsyncpa [#allocation6], 1 }
 0x3db   :  { %2281 = vsyncpa [#allocation9], 1 }
 0x3dc   :  { %2282 = vsyncpa [#allocation4], 1 }

</bundles_post_ra>
